<compile_context>
chip_gen: v6e
topology: v6e:2x2x1
jax: 0.10.0
libtpu: 0.0.40
codegen_flags: <defaults>
</compile_context>

<pallas_src>
import jax
import jax.numpy as jnp
from jax.experimental import pallas as pl
from jax.experimental.pallas import tpu as pltpu


def _round_up(x, m):
    return ((x + m - 1) // m) * m


# ----------------------------------------------------------------------------
# Single fused pallas_call:
#   conv3(3x3,pad=1) + conv4(1x1) folded -> one K=189 bf16 matmul per batch elem
#   + pred_verts / pred_joints
# ----------------------------------------------------------------------------
def res_catconv_forward(img, heat, mask, w3, b3, w4, b4, j_regressor, raw_verts):
    """Returns (uv_inp [B,21,H,W], pred_verts [B,V,3], pred_joints [B,J,3])."""
    B, _, H, W = img.shape
    Cout, Cin = w3.shape[0], w3.shape[1]          # 21, 21
    Hp, Wp = H + 2, W + 2
    Ngrid = Hp * Wp                               # padded-grid spatial size
    NG = _round_up(Ngrid, 128)                    # lane-aligned matmul N / store width
    lead = Wp + 1                                 # flat halo so every tap offset >= 0
    Npad = _round_up(NG + 2 * lead, 128)          # tap slices stay in-bounds
    Cout_pad = _round_up(Cout, 8)                 # sublane-aligned output rows
    K = 9 * Cin                                   # stacked-tap contraction dim (189)
    Vn = raw_verts.shape[1]
    Jn = j_regressor.shape[0]

    # ---- layout plumbing (XLA glue): concat (already channels-major/NCHW),
    #      spatial zero-pad, flatten spatial, add flat halo, cast to bf16 ----
    uv = jnp.concatenate([img, heat, mask], axis=1)                 # [B, 21, H, W]
    xp = jnp.pad(uv, ((0, 0), (0, 0), (1, 1), (1, 1)))              # [B, 21, Hp, Wp]
    xf = xp.reshape(B, Cin, Ngrid)                                  # channels-major, flat
    xbig = jnp.pad(xf, ((0, 0), (0, 0), (lead, Npad - Ngrid - lead)))
    xbig = xbig.astype(jnp.bfloat16)                                # bf16 DMA + MXU rhs

    # ---- fold conv3 + conv4 (no nonlinearity between them in the module) ----
    w3m = jnp.transpose(w3, (2, 3, 1, 0)).reshape(K, Cout)          # [(kh,kw,ci), co]
    w4m = jnp.transpose(w4[:, :, 0, 0], (1, 0))                     # [ci, co]
    w34 = jnp.dot(w3m, w4m, precision=jax.lax.Precision.HIGHEST)    # [K, Cout]
    b34 = jnp.dot(b3, w4m, precision=jax.lax.Precision.HIGHEST) + b4
    wT = jnp.zeros((Cout_pad, K), jnp.float32).at[:Cout].set(w34.T)
    wT = wT.astype(jnp.bfloat16)                                    # bf16 MXU lhs
    b_col = jnp.zeros((Cout_pad, 1), jnp.float32).at[:Cout, 0].set(b34)

    # ---- verts / joints operands in lane-dense (B, 3, V) layout ----
    vT = jnp.transpose(raw_verts, (0, 2, 1)).astype(jnp.float32)     # (B, 3, V)
    jregT = jnp.transpose(j_regressor, (1, 0)).astype(jnp.float32)   # (V, J)

    def kernel(x_ref, w_ref, b_ref, jreg_ref, v_ref,
               o_ref, verts_ref, joints_ref, slab_ref):
        # x_ref:(1,Cin,Npad) bf16 | w_ref:(Cout_pad,K) bf16 | b_ref:(Cout_pad,1) f32
        # jreg_ref:(V,J) f32      | v_ref:(1,3,V) f32
        # o_ref:(1,Cout_pad,NG) f32 | verts_ref:(1,3,V) f32 | joints_ref:(1,3,J) f32
        # slab_ref:(K,NG) bf16 VMEM scratch
        xv = x_ref[0]                                   # (Cin, Npad) bf16, no widen
        for kh in range(3):
            for kw in range(3):
                tap = kh * 3 + kw
                off = kh * Wp + kw                      # static flat tap shift
                slab_ref[tap * Cin:(tap + 1) * Cin, :] = xv[:, off:off + NG]
        # single K=189 bf16 matmul, f32 accumulation, lane-dense (Cout_pad, NG) out
        acc = jnp.dot(w_ref[...], slab_ref[...],
                      preferred_element_type=jnp.float32)
        o_ref[0] = (acc + b_ref[...]).astype(o_ref.dtype)
        # fused verts / joints (removes the second pallas_call launch)
        v = (v_ref[0] + 0.5) * 2.0                      # (3, V)
        verts_ref[0] = v.astype(verts_ref.dtype)
        joints_ref[0] = jnp.dot(
            v, jreg_ref[...], preferred_element_type=jnp.float32
        ).astype(joints_ref.dtype)

    # NOTE: at production resolutions split the flat-spatial axis into row bands
    # (with halo) as a second grid axis and set vmem_limit_bytes explicitly; at
    # these sizes one block per batch element trivially fits VMEM.
    conv_out, vertsT, jointsT = pl.pallas_call(
        kernel,
        out_shape=(jax.ShapeDtypeStruct((B, Cout_pad, NG), jnp.float32),
                   jax.ShapeDtypeStruct((B, 3, Vn), jnp.float32),
                   jax.ShapeDtypeStruct((B, 3, Jn), jnp.float32)),
        grid=(B,),
        in_specs=[
            pl.BlockSpec((1, Cin, Npad), lambda b: (b, 0, 0)),
            pl.BlockSpec((Cout_pad, K), lambda b: (0, 0)),
            pl.BlockSpec((Cout_pad, 1), lambda b: (0, 0)),
            pl.BlockSpec((Vn, Jn), lambda b: (0, 0)),
            pl.BlockSpec((1, 3, Vn), lambda b: (b, 0, 0)),
        ],
        out_specs=(
            pl.BlockSpec((1, Cout_pad, NG), lambda b: (b, 0, 0)),
            pl.BlockSpec((1, 3, Vn), lambda b: (b, 0, 0)),
            pl.BlockSpec((1, 3, Jn), lambda b: (b, 0, 0)),
        ),
        scratch_shapes=[pltpu.VMEM((K, NG), jnp.bfloat16)],
        compiler_params=pltpu.CompilerParams(
            dimension_semantics=("parallel",)),
    )(xbig, wT, b_col, jregT, vT)

    # kernel output is already channels x flat-spatial (NCHW); drop pad rows/cols
    uv_inp = conv_out[:, :Cout, :Ngrid].reshape(B, Cout, Hp, Wp)[:, :, 1:H + 1, 1:W + 1]
    pred_verts = jnp.transpose(vertsT, (0, 2, 1))
    pred_joints = jnp.transpose(jointsT, (0, 2, 1))
    return uv_inp, pred_verts, pred_joints


# ----------------------------------------------------------------------------
# Reference (plain JAX) for verification
# ----------------------------------------------------------------------------
def _convs_ref(img, heat, mask, w3, b3, w4, b4):
    x = jnp.concatenate([img, heat, mask], axis=1)               # NCHW
    x = jnp.transpose(x, (0, 2, 3, 1))                            # NHWC
    y = jax.lax.conv_general_dilated(
        x, jnp.transpose(w3, (2, 3, 1, 0)), (1, 1), ((1, 1), (1, 1)),
        dimension_numbers=('NHWC', 'HWIO', 'NHWC')) + b3[None, None, None, :]
    y = jax.lax.conv_general_dilated(
        y, jnp.transpose(w4, (2, 3, 1, 0)), (1, 1), ((0, 0), (0, 0)),
        dimension_numbers=('NHWC', 'HWIO', 'NHWC')) + b4[None, None, None, :]
    return jnp.transpose(y, (0, 3, 1, 2))                         # NCHW


if __name__ == "__main__":
    key = jax.random.PRNGKey(0)
    ks = jax.random.split(key, 10)

    # img 3ch + heat 17ch + mask 1ch = 21ch; toy vertex/joint counts for J_regressor
    B, H, W = 2, 16, 16
    V, J = 128, 26

    img = jax.random.normal(ks[0], (B, 3, H, W), jnp.float32)
    heat = jax.random.normal(ks[1], (B, 17, H, W), jnp.float32)
    mask = jax.random.normal(ks[2], (B, 1, H, W), jnp.float32)

    # Conv2d(21,21,3,3,pad=1) and Conv2d(21,21,1) parameters
    w3 = jax.random.normal(ks[3], (21, 21, 3, 3), jnp.float32) * 0.05
    b3 = jax.random.normal(ks[4], (21,), jnp.float32) * 0.05
    w4 = jax.random.normal(ks[5], (21, 21, 1, 1), jnp.float32) * 0.05
    b4 = jax.random.normal(ks[6], (21,), jnp.float32) * 0.05

    j_regressor = jax.random.uniform(ks[7], (J, V), jnp.float32)
    j_regressor = j_regressor / jnp.sum(j_regressor, axis=1, keepdims=True)
    raw_verts = jax.random.normal(ks[8], (B, V, 3), jnp.float32)

    # --- Pallas (single fused launch) ---
    uv_inp_out, pred_verts, pred_joints = res_catconv_forward(
        img, heat, mask, w3, b3, w4, b4, j_regressor, raw_verts)
    jax.block_until_ready((uv_inp_out, pred_verts, pred_joints))

    # --- verify against plain-JAX reference ---
    ref_conv = _convs_ref(img, heat, mask, w3, b3, w4, b4)
    ref_verts = (raw_verts + 0.5) * 2.0
    ref_joints = jnp.einsum('jv,bvc->bjc', j_regressor, ref_verts,
                            precision=jax.lax.Precision.HIGHEST)

    assert uv_inp_out.shape == (B, 21, H, W)
    assert pred_verts.shape == (B, V, 3)
    assert pred_joints.shape == (B, J, 3)
    # bf16 activations AND bf16 folded weights over a 189-term contraction ->
    # slightly looser tolerance than the f32-weight version.
    assert jnp.allclose(uv_inp_out, ref_conv, atol=3e-2, rtol=3e-2)
    assert jnp.allclose(pred_verts, ref_verts, atol=1e-5, rtol=1e-5)
    assert jnp.allclose(pred_joints, ref_joints, atol=2e-3, rtol=2e-3)

    print("KERNEL_OK")
</pallas_src>

<mosaic_0001>
module attributes {stable_mosaic.version = 11 : i64} {
  func.func @kernel(%arg0: i32, %arg1: memref<1x21x512xbf16, #tpu.memory_space<vmem>>, %arg2: memref<24x189xbf16, #tpu.memory_space<vmem>>, %arg3: memref<24x1xf32, #tpu.memory_space<vmem>>, %arg4: memref<128x26xf32, #tpu.memory_space<vmem>>, %arg5: memref<1x3x128xf32, #tpu.memory_space<vmem>>, %arg6: memref<1x24x384xf32, #tpu.memory_space<vmem>>, %arg7: memref<1x3x128xf32, #tpu.memory_space<vmem>>, %arg8: memref<1x3x26xf32, #tpu.memory_space<vmem>>, %arg9: memref<189x384xbf16, #tpu.memory_space<vmem>>) attributes {dimension_semantics = [#tpu.dimension_semantics<parallel>], iteration_bounds = array<i64: 2>, scalar_prefetch = 0 : i64, scratch_operands = 1 : i64, tpu.core_type = #tpu.core_type<tc>, window_params = [{transform_indices = @transform_0, window_bounds = array<i64: 1, 21, 512>}, {pipeline_mode = #tpu.pipeline_mode<synchronous>, transform_indices = @transform_1, window_bounds = array<i64: 24, 189>}, {pipeline_mode = #tpu.pipeline_mode<synchronous>, transform_indices = @transform_2, window_bounds = array<i64: 24, 1>}, {pipeline_mode = #tpu.pipeline_mode<synchronous>, transform_indices = @transform_3, window_bounds = array<i64: 128, 26>}, {transform_indices = @transform_4, window_bounds = array<i64: 1, 3, 128>}, {transform_indices = @transform_5, window_bounds = array<i64: 1, 24, 384>}, {transform_indices = @transform_6, window_bounds = array<i64: 1, 3, 128>}, {transform_indices = @transform_7, window_bounds = array<i64: 1, 3, 26>}]} {
    %c0 = arith.constant 0 : index
    %c0_0 = arith.constant 0 : index
    %c0_1 = arith.constant 0 : index
    %0 = vector.load %arg1[%c0, %c0_0, %c0_1] : memref<1x21x512xbf16, #tpu.memory_space<vmem>>, vector<1x21x512xbf16>
    %1 = vector.shape_cast %0 : vector<1x21x512xbf16> to vector<21x512xbf16>
    %2 = vector.extract_strided_slice %1 {offsets = [0, 0], sizes = [21, 384], strides = [1, 1]} : vector<21x512xbf16> to vector<21x384xbf16>
    %c0_2 = arith.constant 0 : index
    %c0_3 = arith.constant 0 : index
    %3 = vector.load %arg9[%c0_2, %c0_3] : memref<189x384xbf16, #tpu.memory_space<vmem>>, vector<21x384xbf16>
    tpu.vector_store %arg9[%c0_2, %c0_3], %2 {strides = array<i32>} : memref<189x384xbf16, #tpu.memory_space<vmem>>, vector<21x384xbf16>,
    %4 = vector.extract_strided_slice %1 {offsets = [0, 1], sizes = [21, 384], strides = [1, 1]} : vector<21x512xbf16> to vector<21x384xbf16>
    %c21 = arith.constant 21 : index
    %c0_4 = arith.constant 0 : index
    %5 = vector.load %arg9[%c21, %c0_4] : memref<189x384xbf16, #tpu.memory_space<vmem>>, vector<21x384xbf16>
    tpu.vector_store %arg9[%c21, %c0_4], %4 {strides = array<i32>} : memref<189x384xbf16, #tpu.memory_space<vmem>>, vector<21x384xbf16>,
    %6 = vector.extract_strided_slice %1 {offsets = [0, 2], sizes = [21, 384], strides = [1, 1]} : vector<21x512xbf16> to vector<21x384xbf16>
    %c42 = arith.constant 42 : index
    %c0_5 = arith.constant 0 : index
    %7 = vector.load %arg9[%c42, %c0_5] : memref<189x384xbf16, #tpu.memory_space<vmem>>, vector<21x384xbf16>
    tpu.vector_store %arg9[%c42, %c0_5], %6 {strides = array<i32>} : memref<189x384xbf16, #tpu.memory_space<vmem>>, vector<21x384xbf16>,
    %8 = vector.extract_strided_slice %1 {offsets = [0, 18], sizes = [21, 384], strides = [1, 1]} : vector<21x512xbf16> to vector<21x384xbf16>
    %c63 = arith.constant 63 : index
    %c0_6 = arith.constant 0 : index
    %9 = vector.load %arg9[%c63, %c0_6] : memref<189x384xbf16, #tpu.memory_space<vmem>>, vector<21x384xbf16>
    tpu.vector_store %arg9[%c63, %c0_6], %8 {strides = array<i32>} : memref<189x384xbf16, #tpu.memory_space<vmem>>, vector<21x384xbf16>,
    %10 = vector.extract_strided_slice %1 {offsets = [0, 19], sizes = [21, 384], strides = [1, 1]} : vector<21x512xbf16> to vector<21x384xbf16>
    %c84 = arith.constant 84 : index
    %c0_7 = arith.constant 0 : index
    %11 = vector.load %arg9[%c84, %c0_7] : memref<189x384xbf16, #tpu.memory_space<vmem>>, vector<21x384xbf16>
    tpu.vector_store %arg9[%c84, %c0_7], %10 {strides = array<i32>} : memref<189x384xbf16, #tpu.memory_space<vmem>>, vector<21x384xbf16>,
    %12 = vector.extract_strided_slice %1 {offsets = [0, 20], sizes = [21, 384], strides = [1, 1]} : vector<21x512xbf16> to vector<21x384xbf16>
    %c105 = arith.constant 105 : index
    %c0_8 = arith.constant 0 : index
    %13 = vector.load %arg9[%c105, %c0_8] : memref<189x384xbf16, #tpu.memory_space<vmem>>, vector<21x384xbf16>
    tpu.vector_store %arg9[%c105, %c0_8], %12 {strides = array<i32>} : memref<189x384xbf16, #tpu.memory_space<vmem>>, vector<21x384xbf16>,
    %14 = vector.extract_strided_slice %1 {offsets = [0, 36], sizes = [21, 384], strides = [1, 1]} : vector<21x512xbf16> to vector<21x384xbf16>
    %c126 = arith.constant 126 : index
    %c0_9 = arith.constant 0 : index
    %15 = vector.load %arg9[%c126, %c0_9] : memref<189x384xbf16, #tpu.memory_space<vmem>>, vector<21x384xbf16>
    tpu.vector_store %arg9[%c126, %c0_9], %14 {strides = array<i32>} : memref<189x384xbf16, #tpu.memory_space<vmem>>, vector<21x384xbf16>,
    %16 = vector.extract_strided_slice %1 {offsets = [0, 37], sizes = [21, 384], strides = [1, 1]} : vector<21x512xbf16> to vector<21x384xbf16>
    %c147 = arith.constant 147 : index
    %c0_10 = arith.constant 0 : index
    %17 = vector.load %arg9[%c147, %c0_10] : memref<189x384xbf16, #tpu.memory_space<vmem>>, vector<21x384xbf16>
    tpu.vector_store %arg9[%c147, %c0_10], %16 {strides = array<i32>} : memref<189x384xbf16, #tpu.memory_space<vmem>>, vector<21x384xbf16>,
    %18 = vector.extract_strided_slice %1 {offsets = [0, 38], sizes = [21, 384], strides = [1, 1]} : vector<21x512xbf16> to vector<21x384xbf16>
    %c168 = arith.constant 168 : index
    %c0_11 = arith.constant 0 : index
    %19 = vector.load %arg9[%c168, %c0_11] : memref<189x384xbf16, #tpu.memory_space<vmem>>, vector<21x384xbf16>
    tpu.vector_store %arg9[%c168, %c0_11], %18 {strides = array<i32>} : memref<189x384xbf16, #tpu.memory_space<vmem>>, vector<21x384xbf16>,
    %c0_12 = arith.constant 0 : index
    %c0_13 = arith.constant 0 : index
    %20 = vector.load %arg2[%c0_12, %c0_13] : memref<24x189xbf16, #tpu.memory_space<vmem>>, vector<24x189xbf16>
    %c0_14 = arith.constant 0 : index
    %c0_15 = arith.constant 0 : index
    %21 = vector.load %arg9[%c0_14, %c0_15] : memref<189x384xbf16, #tpu.memory_space<vmem>>, vector<189x384xbf16>
    %cst = arith.constant dense<0.000000e+00> : vector<24x384xf32>
    %22 = tpu.matmul %20, %21, %cst {dimension_numbers = #tpu.dot_dimension_numbers<[1], [0], [0], [1], [0, 0, 1, 1], [], []>} : vector<24x189xbf16>, vector<189x384xbf16>, vector<24x384xf32> -> vector<24x384xf32>
    %c0_16 = arith.constant 0 : index
    %c0_17 = arith.constant 0 : index
    %23 = vector.load %arg3[%c0_16, %c0_17] : memref<24x1xf32, #tpu.memory_space<vmem>>, vector<24x1xf32>
    %24 = vector.broadcast %23 : vector<24x1xf32> to vector<24x384xf32>
    %25 = arith.addf %22, %24 : vector<24x384xf32>
    %c0_18 = arith.constant 0 : index
    %c0_19 = arith.constant 0 : index
    %c0_20 = arith.constant 0 : index
    %26 = vector.load %arg6[%c0_18, %c0_19, %c0_20] : memref<1x24x384xf32, #tpu.memory_space<vmem>>, vector<1x24x384xf32>
    %27 = vector.shape_cast %26 : vector<1x24x384xf32> to vector<24x384xf32>
    %28 = vector.shape_cast %25 : vector<24x384xf32> to vector<1x24x384xf32>
    tpu.vector_store %arg6[%c0_18, %c0_19, %c0_20], %28 {strides = array<i32>} : memref<1x24x384xf32, #tpu.memory_space<vmem>>, vector<1x24x384xf32>,
    %c0_21 = arith.constant 0 : index
    %c0_22 = arith.constant 0 : index
    %c0_23 = arith.constant 0 : index
    %29 = vector.load %arg5[%c0_21, %c0_22, %c0_23] : memref<1x3x128xf32, #tpu.memory_space<vmem>>, vector<1x3x128xf32>
    %30 = vector.shape_cast %29 : vector<1x3x128xf32> to vector<3x128xf32>
    %cst_24 = arith.constant 5.000000e-01 : f32
    %31 = vector.broadcast %cst_24 : f32 to vector<3x128xf32>
    %32 = arith.addf %30, %31 : vector<3x128xf32>
    %cst_25 = arith.constant 2.000000e+00 : f32
    %33 = vector.broadcast %cst_25 : f32 to vector<3x128xf32>
    %34 = arith.mulf %32, %33 : vector<3x128xf32>
    %c0_26 = arith.constant 0 : index
    %c0_27 = arith.constant 0 : index
    %c0_28 = arith.constant 0 : index
    %35 = vector.load %arg7[%c0_26, %c0_27, %c0_28] : memref<1x3x128xf32, #tpu.memory_space<vmem>>, vector<1x3x128xf32>
    %36 = vector.shape_cast %35 : vector<1x3x128xf32> to vector<3x128xf32>
    %37 = vector.shape_cast %34 : vector<3x128xf32> to vector<1x3x128xf32>
    tpu.vector_store %arg7[%c0_26, %c0_27, %c0_28], %37 {strides = array<i32>} : memref<1x3x128xf32, #tpu.memory_space<vmem>>, vector<1x3x128xf32>,
    %c0_29 = arith.constant 0 : index
    %c0_30 = arith.constant 0 : index
    %38 = vector.load %arg4[%c0_29, %c0_30] : memref<128x26xf32, #tpu.memory_space<vmem>>, vector<128x26xf32>
    %cst_31 = arith.constant dense<0.000000e+00> : vector<3x26xf32>
    %39 = tpu.matmul %34, %38, %cst_31 {dimension_numbers = #tpu.dot_dimension_numbers<[1], [0], [0], [1], [0, 0, 1, 1], [], []>} : vector<3x128xf32>, vector<128x26xf32>, vector<3x26xf32> -> vector<3x26xf32>
    %c0_32 = arith.constant 0 : index
    %c0_33 = arith.constant 0 : index
    %c0_34 = arith.constant 0 : index
    %40 = vector.load %arg8[%c0_32, %c0_33, %c0_34] : memref<1x3x26xf32, #tpu.memory_space<vmem>>, vector<1x3x26xf32>
    %41 = vector.shape_cast %40 : vector<1x3x26xf32> to vector<3x26xf32>
    %42 = vector.shape_cast %39 : vector<3x26xf32> to vector<1x3x26xf32>
    tpu.vector_store %arg8[%c0_32, %c0_33, %c0_34], %42 {strides = array<i32>} : memref<1x3x26xf32, #tpu.memory_space<vmem>>, vector<1x3x26xf32>,
    return
  }
  func.func @transform_0(%arg0: i32) -> (i32, i32, i32) {
    %c0_i32 = arith.constant 0 : i32
    %c0_i32_0 = arith.constant 0 : i32
    %c0_i32_1 = arith.constant 0 : i32
    return %arg0, %c0_i32, %c0_i32_0 : i32, i32, i32
  }
  func.func @transform_1(%arg0: i32) -> (i32, i32) {
    %c0_i32 = arith.constant 0 : i32
    %c0_i32_0 = arith.constant 0 : i32
    %c0_i32_1 = arith.constant 0 : i32
    return %c0_i32, %c0_i32_0 : i32, i32
  }
  func.func @transform_2(%arg0: i32) -> (i32, i32) {
    %c0_i32 = arith.constant 0 : i32
    %c0_i32_0 = arith.constant 0 : i32
    %c0_i32_1 = arith.constant 0 : i32
    return %c0_i32, %c0_i32_0 : i32, i32
  }
  func.func @transform_3(%arg0: i32) -> (i32, i32) {
    %c0_i32 = arith.constant 0 : i32
    %c0_i32_0 = arith.constant 0 : i32
    %c0_i32_1 = arith.constant 0 : i32
    return %c0_i32, %c0_i32_0 : i32, i32
  }
  func.func @transform_4(%arg0: i32) -> (i32, i32, i32) {
    %c0_i32 = arith.constant 0 : i32
    %c0_i32_0 = arith.constant 0 : i32
    %c0_i32_1 = arith.constant 0 : i32
    return %arg0, %c0_i32, %c0_i32_0 : i32, i32, i32
  }
  func.func @transform_5(%arg0: i32) -> (i32, i32, i32) {
    %c0_i32 = arith.constant 0 : i32
    %c0_i32_0 = arith.constant 0 : i32
    %c0_i32_1 = arith.constant 0 : i32
    return %arg0, %c0_i32, %c0_i32_0 : i32, i32, i32
  }
  func.func @transform_6(%arg0: i32) -> (i32, i32, i32) {
    %c0_i32 = arith.constant 0 : i32
    %c0_i32_0 = arith.constant 0 : i32
    %c0_i32_1 = arith.constant 0 : i32
    return %arg0, %c0_i32, %c0_i32_0 : i32, i32, i32
  }
  func.func @transform_7(%arg0: i32) -> (i32, i32, i32) {
    %c0_i32 = arith.constant 0 : i32
    %c0_i32_0 = arith.constant 0 : i32
    %c0_i32_1 = arith.constant 0 : i32
    return %arg0, %c0_i32, %c0_i32_0 : i32, i32, i32
  }
}

</mosaic_0001>

<bundles_post_ra>
// kernel: tpu_custom_call.1
= control target key start
LH: loop header
LB: loop body
LE: loop exit
PB: predicated region body
PF: predicated region fallthrough
CT: control target
= control target key end

     0   :  { %13 = vsyncpa [#allocation4], 0  ;;  %s2717_s0 = inlined_call_operand.vmem [shape: bf16[2,21,512], index: 0, kind: input, shape index: {}]   ;;  %s2718_s1 = inlined_call_operand.vmem [shape: bf16[24,189], index: 1, kind: input, shape index: {}]   ;;  %s2719_s2 = inlined_call_operand.vmem [shape: f32[24,1], index: 2, kind: input, shape index: {}]   ;;  %s2720_s3 = inlined_call_operand.vmem [shape: f32[128,26], index: 3, kind: input, shape index: {}]   ;;  %s2721_s4 = inlined_call_operand.vmem [shape: f32[2,3,128], index: 4, kind: input, shape index: {}]   ;;  %s2722_s5 = inlined_call_operand.hbm [shape: f32[2,24,384], index: 5, kind: output, shape index: {0}]   ;;  %s2723_s6 = inlined_call_operand.vmem [shape: f32[2,3,128], index: 6, kind: output, shape index: {1}]   ;;  %s2724_s7 = inlined_call_operand.vmem [shape: f32[2,3,26], index: 7, kind: output, shape index: {2}]  }
   0x1   :  { %15 = vsyncpa [#allocation4 + $0x1], 0  ;;  %s1935_s24 = smov 0   ;;  %s1937_s25 = smov 0  }
   0x2   :  { %s1939_s26 = smov 0   ;;  %s1941_s27 = smov 0  }
   0x3 LB: > { %s1956_s28 = sadd.s32 4294967295, %s1878_s27   ;;  %s1628_s29 = sadd.s32 4294967294, %s1878_s27   ;;  %s1878_s27 = sphi %s1941_s27, %s2784_s27   ;;  %s1874_s26 = sphi %s1939_s26, %s2783_s26   ;;  %s1870_s25 = sphi %s1937_s25, %s2782_s25   ;;  %s1866_s24 = sphi %s1935_s24, %s2781_s24  }
   0x4   : > { %s1960_s30 = sadd.s32 1, %s1878_s27   ;;  %s143_s8 = sadd.s32 1, %s1874_s26 }
   0x5   : > { %s140_s9 = ssub.s32 %s1878_s27, %s1960_s30  ;;  %p153_p0 = scmp.ne.s32.totalorder %s1874_s26, %s1870_s25 }
   0x6   : > { %p141_p1 = scmp.eq.s32.totalorder %s140_s9, 0  ;;  %p154_p2 = scmp.eq.s32.totalorder %s1956_s28, 1 }
   0x7   : > { %p159_p3 = scmp.ne.s32.totalorder %s1870_s25, %s1866_s24  ;;  %p160_p4 = scmp.eq.s32.totalorder %s1628_s29, 1 }
   0x8   : > { %s1971_s10 = scalar_select %p141_p1, %s1874_s26, %s143_s8  }
   0x9   : > { %p1973_p5 = por %p154_p2, %p153_p0  ;;  %p1977_p6 = por %p160_p4, %p159_p3 }
   0xa   : > { %p1631_p7 = scmp.ge.s32.totalorder %s1878_s27, 1  ;;  %p254_p8 = scmp.lt.s32.totalorder %s1878_s27, 3 }
   0xc   : > { %p255_p9 = pnand %p1631_p7, %p254_p8 }
   0xd   : > { %p298_p10 = scmp.lt.s32.totalorder (!%p255_p9), %s1956_s28, 1  ;;  %s1880_s18 = smov (!%p255_p9), 92  }
   0xe   : > { %258 = sbr.rel (%p255_p9) target bundleno = 488 (0x1e8), region = 40  ;;  %s1881_s19 = smov (!%p255_p9), 109  }
   0xf   : > { %s1882_s20 = smov (!%p255_p9), 108   ;;  %s1883_s21 = smov (!%p255_p9), 126  }
  0x10   : > { %s1884_s22 = smov (!%p255_p9), 110   ;;  %s1886_s23 = smov (!%p255_p9), 127  }
  0x11   : > { %s1887_s29 = smov (!%p255_p9), 90   ;;  %s1888_s8 = smov (!%p255_p9), 91  }
  0x13   : > { %s1985_s13 = scalar_select %p298_p10, %s1956_s28, 1  ;;  %vm701_vm0 = vsmask.f32 256  ;;  %vm712_vm1 = vsmask.f32 4368  ;;  %vm471_vm3 = vcmask 1044484  }
  0x14   : > { %vm703_vm2 = vsmask.f32 4352  ;;  %vm2041_vm5 = vmor %vm701_vm0, %vm712_vm1  ;;  %vm470_vm6 = vcmask 1040384   ;;  %vm631_vm9 = vcmask 1041408   ;;  %vm632_vm10 = vcmask 1045508  }
  0x15   : > { %s1736_s14 = smul.u32 48, %s1985_s13  ;;  %vm2027_vm4 = vmand %vm471_vm3, %vm703_vm2  ;;  %vm525_vm13 = vsmask.f32 3328  ;;  %vm537_vm14 = vsmask.f32 7440  ;;  %s2379_s15 = sshll.u32 %s1985_s13, 2 }
  0x16   : > { %vm2054_vm7 = vmand %vm470_vm6, %vm701_vm0  ;;  %vm851_vm15 = vsmask.f32 1280  ;;  %vm862_vm0 = vsmask.f32 5392 }
  0x17   : > { %s302_s17 = scalar_lea.vmem %s2717_s0, %s1736_s14  ;;  %vm705_vm8 = vmor %vm2027_vm4, %vm2054_vm7  ;;  %s1737_s14 = smul.u32 1152, %s1956_s28 }
  0x18   : > { %v1991_v0 = vld [vmem:[%s302_s17 + $0x8] sm:$0xff]  ;;  %v1993_v1 = vld [vmem:[%s302_s17] sm:$0xff]  ;;  %v2002_v6 = vld [vmem:[%s302_s17 + $0x10] sm:$0xff] }
  0x19   : > { %v1995_v2 = vld [vmem:[%s302_s17 + $0x20] sm:$0x77]  ;;  %v785_v3 = vrot.slane %v1991_v0, 5  ;;  %323 = vst [vmem:[#allocation2 + $0x8] sm:$0xf] %v1991_v0  ;;  %v784_v4 = vrot.slane %v1993_v1, 5  ;;  %vm2108_vm11 = vmor %vm631_vm9, %vm632_vm10  ;;  %s2665_s13 = scalar_lea.hbm %s2722_s5, %s1737_s14 }
  0x1a   : > { %322 = vst [vmem:[#allocation2] sm:$0xff] %v1993_v1  ;;  %v643_v5 = vrot.slane %v1995_v2, 6  ;;  %v2005_v7 = vshrl.u32 %v1993_v1, 16  ;;  %v2007_v8 = vld [vmem:[%s302_s17 + $0x18] sm:$0xff]  ;;  %v2010_v9 = vshrl.u32 %v2002_v6, 16  ;;  %v2013_v10 = vshll.u32 %v2002_v6, 16  ;;  %vm2128_vm12 = vmor %vm470_vm6, %vm471_vm3 }
  0x1b   : > { %324 = vst [vmem:[#allocation2 + $0xc] sm:$0xff] %v2002_v6  ;;  %v2016_v11 = vld [vmem:[%s302_s17 + $0x28] sm:$0x77]  ;;  %v2019_v12 = vshrl.u32 %v1991_v0, 16  ;;  %v2022_v13 = vshrl.u32 %v2007_v8, 16  ;;  %802 = vrot.lane.b32.xlu1 %v785_v3, %s1880_s18  ;;  %800 = vrot.lane.b32.xlu0 %v784_v4, %s1880_s18  ;;  %v2049_v20 = vshll.u32 %v2007_v8, 16  ;;  %vm2176_vm1 = vmor %vm851_vm15, %vm862_vm0 }
  0x1c   : > { %325 = vst [vmem:[#allocation2 + $0x14] sm:$0xf] %v2007_v8  ;;  %v648_v15 = vrot.slane %v643_v5, 4  ;;  %v714_v17 = vrot.slane %v2005_v7, 7  ;;  %v719_v18 = vrot.slane %v2010_v9, 7  ;;  %v646_v19 = vrot.slane %v2016_v11, 6  ;;  %vm2195_vm2 = vmor %vm525_vm13, %vm537_vm14 }
  0x1d   : > { %v716_v21 = vrot.slane %v2019_v12, 7  ;;  %v723_v24 = vrot.slane %v2022_v13, 7  ;;  %v2060_v25 = vshrl.u32 %v1995_v2, 16  ;;  %v2063_v26 = vshll.u32 %v1995_v2, 16 }
  0x1e   : > { %v718_v23 = vrot.slane %v714_v17, 4  ;;  %v720_v27 = vor.u32 %v719_v18, %v2013_v10  ;;  %v649_v28 = vrot.slane %v646_v19, 4  ;;  %v2074_v32 = vshrl.u32 %v2016_v11, 16 }
  0x1f   : > { %v722_v29 = vrot.slane %v716_v21, 4  ;;  %662 = vrot.lane.b32.xlu0 %v648_v15, %s1881_s19  ;;  %v724_v30 = vor.u32 %v723_v24, %v2049_v20  ;;  %v727_v31 = vrot.slane %v2060_v25, 7  ;;  %v2077_v33 = vshll.u32 %v2016_v11, 16 }
  0x20   : > { %v721_v34 = vsel %vm2041_vm5, %v718_v23, %v720_v27  ;;  %v726_v35 = vrot.slane %v719_v18, 4  ;;  %v731_v37 = vrot.slane %v2074_v32, 7  ;;  %v730_v39 = vrot.slane %v723_v24, 4 }
  0x21   : > { %738 = vrot.lane.b32.xlu1 %v721_v34, %s1882_s20  ;;  %v728_v36 = vor.u32 %v727_v31, %v2063_v26  ;;  %v725_v38 = vsel %vm2041_vm5, %v722_v29, %v724_v30  ;;  %v2089_v41 = vshll.u32 %v1993_v1, 16  ;;  %v637_v43 = vrot.slane %v2002_v6, 6 }
  0x22   : > { %v732_v40 = vor.u32 %v731_v37, %v2077_v33  ;;  %v2096_v44 = vshll.u32 %v1991_v0, 16  ;;  %v640_v46 = vrot.slane %v2007_v8, 6  ;;  %v476_v49 = vrot.slane %v2002_v6, 7 }
  0x23   : > { %664 = vrot.lane.b32.xlu0 %v649_v28, %s1881_s19  ;;  %v729_v42 = vsel %vm2041_vm5, %v726_v35, %v728_v36  ;;  %v715_v47 = vor.u32 %v714_v17, %v2089_v41  ;;  %v642_v48 = vrot.slane %v637_v43, 4  ;;  %v479_v53 = vrot.slane %v2007_v8, 7 }
  0x24   : > { %v733_v45 = vsel %vm2041_vm5, %v730_v39, %v732_v40  ;;  %v717_v50 = vor.u32 %v716_v21, %v2096_v44  ;;  %v645_v52 = vrot.slane %v640_v46, 4  ;;  %v554_v54 = vrot.slane %v2063_v26, 5 }
  0x25   : > { %740 = vrot.lane.b32.xlu1 %v725_v38, %s1882_s20  ;;  %v561_v55 = vrot.slane %v2060_v25, 4  ;;  %v644_v56 = vsel %vm2108_vm11, %v642_v48, %v643_v5  ;;  %v481_v57 = vrot.slane %v476_v49, 4  ;;  %v482_v58 = vrot.slane %v1995_v2, 7 }
  0x26   : > { %v559_v60 = vrot.slane %v2077_v33, 5  ;;  %v564_v61 = vrot.slane %v2074_v32, 4  ;;  %v647_v62 = vsel %vm2108_vm11, %v645_v52, %v646_v19  ;;  %v484_v63 = vrot.slane %v479_v53, 4 }
  0x27   : > { %742 = vrot.lane.b32.xlu0 %v729_v42, %s1882_s20  ;;  %v485_v5 = vrot.slane %v2016_v11, 7  ;;  %v562_v15 = vor.u32 %v561_v55, %v554_v54  ;;  %v483_v16 = vsel %vm2128_vm12, %v481_v57, %v482_v58  ;;  %v634_v17 = vrot.slane %v1993_v1, 6 }
  0x28   : > { %v539_v18 = vrot.slane %v2089_v41, 5  ;;  %v541_v21 = vrot.slane %v2005_v7, 4  ;;  %v565_v19 = vor.u32 %v564_v61, %v559_v60  ;;  %v635_v27 = vrot.slane %v1991_v0, 6 }
  0x29   : > { %744 = vrot.lane.b32.xlu1 %v733_v45, %s1882_s20  ;;  %v486_v23 = vsel %vm2128_vm12, %v484_v63, %v485_v5  ;;  %v563_v24 = vrot.slane %v562_v15, 4  ;;  %v636_v28 = vrot.slane %v634_v17, 4  ;;  %v540_v31 = vrot.slane %v2096_v44, 5 }
  0x2a   : > { %v542_v29 = vor.u32 %v541_v21, %v539_v18  ;;  %v566_v30 = vrot.slane %v565_v19, 4  ;;  %v546_v34 = vrot.slane %v2019_v12, 4  ;;  %v876_v35 = vrot.slane %v2022_v13, 6 }
  0x2b   : > { %734 = vrot.lane.b32.xlu0 %v715_v47, %s1882_s20  ;;  %v877_v36 = vrot.slane %v2049_v20, 7  ;;  %v639_v37 = vrot.slane %v635_v27, 4  ;;  %v544_v38 = vrot.slane %v2013_v10, 5  ;;  %v549_v39 = vrot.slane %v2049_v20, 5 }
  0x2c   : > { %v551_v40 = vrot.slane %v2010_v9, 4  ;;  %v638_v42 = vsel %vm2108_vm11, %v636_v28, %v637_v43  ;;  %v543_v45 = vrot.slane %v542_v29, 4  ;;  %v886_v48 = vrot.slane %v2074_v32, 6 }
  0x2d   : > { %736 = vrot.lane.b32.xlu1 %v717_v50, %s1882_s20  ;;  %v878_v47 = vor.u32 %v877_v36, %v876_v35  ;;  %v547_v50 = vor.u32 %v546_v34, %v540_v31  ;;  %v556_v52 = vrot.slane %v2022_v13, 4  ;;  %v887_v55 = vrot.slane %v2077_v33, 7  ;;  %s310_s20 = scalar_lea.vmem %s2723_s6, %s2379_s15 }
  0x2e   : > { %v872_v58 = vrot.slane %v2013_v10, 7  ;;  %v881_v61 = vrot.slane %v2060_v25, 6  ;;  %v552_v63 = vor.u32 %v551_v40, %v544_v38  ;;  %v867_v15 = vrot.slane %v2019_v12, 6 }
  0x2f   : > { %658 = vrot.lane.b32.xlu0 %v644_v56, %s1881_s19  ;;  %v871_v56 = vrot.slane %v2010_v9, 6  ;;  %v885_v43 = vrot.slane %v878_v47, 4  ;;  %v888_v5 = vor.u32 %v887_v55, %v886_v48  ;;  %v641_v28 = vsel %vm2108_vm11, %v639_v37, %v640_v46 }
  0x30   : > { %v548_v34 = vrot.slane %v547_v50, 4  ;;  %v557_v35 = vor.u32 %v556_v52, %v549_v39  ;;  %v545_v51 = vsel %vm2195_vm2, %v543_v45, %v544_v38  ;;  %v553_v37 = vrot.slane %v552_v63, 4 }
  0x31   : > { %660 = vrot.lane.b32.xlu1 %v647_v62, %s1881_s19  ;;  %v882_v62 = vrot.slane %v2063_v26, 7  ;;  %v873_v21 = vor.u32 %v872_v58, %v871_v56  ;;  %v2201_v29 = vsel %vm2176_vm1, %v885_v43, %v888_v5  ;;  %v473_v50 = vrot.slane %v1993_v1, 7 }
  0x32   : > { %v361_v52 = vrot.slane %v2010_v9, 5  ;;  %v550_v38 = vsel %vm2195_vm2, %v548_v34, %v549_v39  ;;  %v558_v45 = vrot.slane %v557_v35, 4  ;;  %v1885_v43 = vmov 0  }
  0x33   : > { %495 = vrot.lane.b32.xlu0 %v483_v16, %s1883_s21  ;;  %v868_v16 = vrot.slane %v2096_v44, 7  ;;  %v883_v19 = vor.u32 %v882_v62, %v881_v61  ;;  %1329 = vmatprep.subr.bf16.mxu1 %v1885_v43  ;;  %v555_v9 = vsel %vm2195_vm2, %v553_v37, %v554_v54  ;;  %v374_v39 = vrot.slane %v2049_v20, 6 }
  0x34   : > { %1796 = vset.pattern.permute.xlu1 %v1885_v43  ;;  %1797 = vset.pattern.permute.xlu0 %v1885_v43  ;;  %v475_v57 = vrot.slane %v473_v50, 4  ;;  %v560_v54 = vsel %vm2195_vm2, %v558_v45, %v559_v60  ;;  %v381_v61 = vrot.slane %v2060_v25, 5  ;;  %v1791_v20 = vpack.i.bf16 %v540_v31, %v539_v18 }
  0x35   : > { %497 = vrot.lane.b32.xlu1 %v486_v23, %s1883_s21  ;;  %v864_v23 = vrot.slane %v2005_v7, 6  ;;  %vm327_vm3 = vsmask.f32 2304  ;;  %vm339_vm5 = vsmask.f32 6416  ;;  %v391_v5 = vrot.slane %v2074_v32, 5 }
  0x36   : > { %vm330_vm6 = vsmask.f32 6400  ;;  %v394_v60 = vrot.slane %v2077_v33, 6  ;;  %v477_v25 = vsel %vm2128_vm12, %v475_v57, %v476_v49  ;;  %vm2263_vm11 = vmor %vm327_vm3, %vm339_vm5  ;;  %vm329_vm14 = vcmask 1046532  }
  0x37   : > { %579 = vrot.lane.b32.xlu0 %v563_v24, %s1884_s22  ;;  %v865_v24 = vrot.slane %v2089_v41, 7  ;;  %vm2269_vm0 = vmand %vm329_vm14, %vm330_vm6  ;;  %v347_v34 = vrot.slane %v2089_v41, 6  ;;  %vm2725_vm5 = vcmask 498688   ;;  %vm2726_vm6 = vcmask 752640  }
  0x39   : > { %581 = vrot.lane.b32.xlu1 %v566_v30, %s1884_s22  ;;  %v2203_v30 = vor.u32 %v868_v16, %v867_v15  ;;  %v2205_v36 = vor.u32 %v865_v24, %v864_v23  ;;  %v395_v15 = vor.u32 %v394_v60, %v391_v5 }
  0x3b   : > { %650 = vrot.lane.b32.xlu0 %v634_v17, %s1881_s19  ;;  %v875_v46 = vrot.slane %v2203_v30, 4  ;;  %v870_v48 = vrot.slane %v2205_v36, 4  ;;  %v344_v17 = vrot.slane %v2005_v7, 5  ;;  %v398_v35 = vrot.slane %v395_v15, 4 }
  0x3d   : > { %652 = vrot.lane.b32.xlu1 %v635_v27, %s1881_s19  ;;  %v880_v27 = vrot.slane %v873_v21, 4  ;;  %v2222_v55 = vsel %vm2176_vm1, %v875_v46, %v878_v47  ;;  %v2228_v56 = vsel %vm2176_vm1, %v870_v48, %v873_v21  ;;  %v371_v47 = vrot.slane %v2022_v13, 5  ;;  %v336_v21 = vld [vmem:[#allocation2 + $0x20] sm:$0x7] }
  0x3e   : > { %v384_v13 = vrot.slane %v2063_v26, 6  ;;  %v355_v46 = vrot.slane %v2096_v44, 6  ;;  %v793_v44 = vrot.slane %v1995_v2, 5 }
  0x3f   : > { %654 = vrot.lane.b32.xlu0 %v638_v42, %s1881_s19  ;;  %v2213_v40 = vsel %vm2176_vm1, %v880_v27, %v883_v19  ;;  %v364_v42 = vrot.slane %v2013_v10, 6  ;;  %v474_v10 = vrot.slane %v1991_v0, 7  ;;  %v375_v63 = vor.u32 %v374_v39, %v371_v47 }
  0x40   : > { %v385_v31 = vor.u32 %v384_v13, %v381_v61  ;;  %vm326_vm1 = vcmask 1042432   ;;  %v352_v27 = vrot.slane %v2019_v12, 5  ;;  %v709_v61 = vld [vmem:[#allocation2 + $0xa4] sm:$0x1] }
  0x41   : > { %656 = vrot.lane.b32.xlu1 %v641_v28, %s1881_s19  ;;  %v365_v58 = vor.u32 %v364_v42, %v361_v52  ;;  %v478_v62 = vrot.slane %v474_v10, 4  ;;  %v387_v49 = vrot.slane %v375_v63, 4  ;;  %vm2280_vm2 = vmand %vm326_vm1, %vm327_vm3  ;;  %v796_v52 = vrot.slane %v2016_v11, 5 }
  0x42   : > { %v337_v59 = vsel %vm2280_vm2, %v2016_v11, %v336_v21  ;;  %v397_v28 = vrot.slane %v385_v31, 4  ;;  %v356_v37 = vor.u32 %v355_v46, %v352_v27  ;;  %vm783_vm3 = vmor %vm326_vm1, %vm329_vm14  ;;  %vm675_vm14 = vcmask 891904  }
  0x43   : > { %571 = vrot.lane.b32.xlu0 %v545_v51, %s1884_s22  ;;  %v377_v18 = vrot.slane %v365_v58, 4  ;;  %v480_v33 = vsel %vm2128_vm12, %v478_v62, %v479_v53  ;;  %vm332_vm12 = vmor %vm2269_vm0, %vm2280_vm2  ;;  %v333_v53 = vld [vmem:[#allocation2 + $0x18] sm:$0x77]  ;;  %338 = vst [vmem:[#allocation2 + $0x20] sm:$0x7] %v337_v59  ;;  %v396_v24 = vsel %vm2263_vm11, %v387_v49, %v395_v15  ;;  %v348_v51 = vor.u32 %v347_v34, %v344_v17 }
  0x44   : > { %v334_v23 = vsel %vm332_vm12, %v1995_v2, %v333_v53  ;;  %v367_v7 = vrot.slane %v356_v37, 4  ;;  %v799_v42 = vrot.slane %v796_v52, 4  ;;  %vm753_vm1 = vcmask 883712  }
  0x45   : > { %573 = vrot.lane.b32.xlu1 %v550_v38, %s1884_s22  ;;  %v386_v19 = vsel %vm2263_vm11, %v377_v18, %v385_v31  ;;  %335 = vst [vmem:[#allocation2 + $0x18] sm:$0x77] %v334_v23  ;;  %v357_v48 = vrot.slane %v348_v51, 4 }
  0x46   : > { %v376_v12 = vsel %vm2263_vm11, %v367_v7, %v375_v63 }
  0x47   : > { %575 = vrot.lane.b32.xlu0 %v555_v9, %s1884_s22  ;;  %v366_v41 = vsel %vm2263_vm11, %v357_v48, %v365_v58  ;;  %vm423_vm11 = vcmask 1043456  }
  0x49   : > { %577 = vrot.lane.b32.xlu1 %v560_v54, %s1884_s22 }
  0x4b   : > { %1792 = vrot.lane.b32.xlu0 %v1791_v20, %s1884_s22  ;;  %v706_v20 = vld [vmem:[#allocation2 + $0x9c] sm:$0x11] }
  0x4d   : > { %491 = vrot.lane.b32.xlu1 %v477_v25, %s1883_s21 }
  0x4f   : > { %493 = vrot.lane.b32.xlu0 %v480_v33, %s1883_s21 }
  0x51   : > { %407 = vrot.lane.b32.xlu1 %v386_v19, %s1886_s23 }
  0x53   : > { %409 = vrot.lane.b32.xlu0 %v396_v24, %s1886_s23 }
  0x55   : > { %411 = vrot.lane.b32.xlu1 %v397_v28, %s1886_s23 }
  0x57   : > { %413 = vrot.lane.b32.xlu0 %v398_v35, %s1886_s23 }
  0x59   : > { %487 = vrot.lane.b32.xlu1 %v473_v50, %s1883_s21  ;;  %v798_v50 = vrot.slane %v793_v44, 4 }
  0x5b   : > { %489 = vrot.lane.b32.xlu0 %v474_v10, %s1883_s21 }
  0x5d   : > { %399 = vrot.lane.b32.xlu1 %v348_v51, %s1886_s23 }
  0x5f   : > { %401 = vrot.lane.b32.xlu0 %v356_v37, %s1886_s23 }
  0x61   : > { %403 = vrot.lane.b32.xlu1 %v366_v41, %s1886_s23 }
  0x63   : > { %405 = vrot.lane.b32.xlu0 %v376_v12, %s1886_s23 }
  0x65   : > { %949 = vrot.lane.b32.xlu1 %v1995_v2, %s1887_s29  ;;  %v786_v2 = vrot.slane %v784_v4, 4 }
  0x67   : > { %951 = vrot.lane.b32.xlu0 %v2016_v11, %s1887_s29  ;;  %v787_v11 = vrot.slane %v2002_v6, 5 }
  0x69   : > { %812 = vrot.lane.b32.xlu1 %v798_v50, %s1880_s18  ;;  %v788_v38 = vsel %vm783_vm3, %v786_v2, %v787_v11  ;;  %v792_v45 = vrot.slane %v787_v11, 4 }
  0x6b   : > { %814 = vrot.lane.b32.xlu0 %v799_v42, %s1880_s18 }
  0x6d   : > { %945 = vrot.lane.b32.xlu1 %v2002_v6, %s1887_s29  ;;  %v794_v6 = vsel %vm783_vm3, %v792_v45, %v793_v44  ;;  %v1037_v45 = vld [vmem:[%s2719_s2 + $0x8] sm:$0xff] }
  0x6f   : > { %947 = vrot.lane.b32.xlu0 %v2007_v8, %s1887_s29 }
  0x71   : > { %898 = vrot.lane.b32.xlu1 %v2213_v40, %s1888_s8  ;;  %v789_v40 = vrot.slane %v785_v3, 4 }
  0x73   : > { %900 = vrot.lane.b32.xlu0 %v2201_v29, %s1888_s8  ;;  %v790_v29 = vrot.slane %v2007_v8, 5 }
  0x75   : > { %941 = vrot.lane.b32.xlu1 %v1993_v1, %s1887_s29  ;;  %v791_v1 = vsel %vm783_vm3, %v789_v40, %v790_v29  ;;  %v795_v4 = vrot.slane %v790_v29, 4  ;;  %v452_v40 = vld [vmem:[#allocation2 + $0x18] sm:$0xcc] }
  0x77   : > { %943 = vrot.lane.b32.xlu0 %v1991_v0, %s1887_s29  ;;  %v1815_v0 = vld [vmem:[%s2718_s1 + $0x4] ss:$8 sps:$4 sm:$0xff]   ;;  %s283_s29 = sand.u32 1, %s1870_s25  }
  0x78   : > { %1676 = vmatprep.mubr.msk.bf16.mxu0 %vm2725_vm5, %v1815_v0  ;;  %1678 = vmatprep.mubr.msk.bf16.mxu1 %vm2725_vm5, %v1815_v0  ;;  %vm527_vm5 = vcmask 1047556   ;;  %s2673_s28 = scalar_lea.sflag [#allocation4], %s283_s29 }
  0x79   : > { %890 = vrot.lane.b32.xlu1 %v2205_v36, %s1888_s8 }
  0x7b   : > { %892 = vrot.lane.b32.xlu0 %v2203_v30, %s1888_s8  ;;  %v797_v30 = vsel %vm783_vm3, %v795_v4, %v796_v52  ;;  %vm768_vm3 = vsmask.f32 7938 }
  0x7c   : > { %vm2366_vm4 = vmand %vm423_vm11, %vm768_vm3 }
  0x7d   : > { %894 = vrot.lane.b32.xlu1 %v2228_v56, %s1888_s8  ;;  %vm2400_vm3 = vmand %vm423_vm11, %vm525_vm13 }
  0x7f   : > { %896 = vrot.lane.b32.xlu0 %v2222_v55, %s1888_s8  ;;  %s1735_s8 = smul.u32 72, %s283_s29 }
  0x81   : > { %804 = vrot.lane.b32.xlu1 %v788_v38, %s1880_s18  ;;  %v1036_v38 = vld [vmem:[%s2719_s2] sm:$0xff]  ;;  %s2651_s9 = scalar_lea.vmem [#allocation3], %s1735_s8 }
  0x82   : > { %s1500_s16 = sshll.u32 %s2651_s9, 4  ;;  %s2668_s16 = int_to_ptr.vmem [resolvable:$true] %s1500_s16 }
  0x83   : > { %806 = vrot.lane.b32.xlu0 %v791_v1, %s1880_s18  ;;  %s1818_s19 = scalar_lea.vmem %s2668_s16, 1152 }
  0x84   : > { %p1819_p11 = scmp.ne.s32.totalorder %s2668_s16, %s1818_s19 }
  0x85   : > { %808 = vrot.lane.b32.xlu1 %v794_v6, %s1880_s18 }
  0x86   : > { %p1820_p12 = pnand %p1819_p11, %p1973_p5 }
  0x87   : > { %810 = vrot.lane.b32.xlu0 %v797_v30, %s1880_s18  ;;  %s306_s18 = scalar_lea.vmem %s2721_s4, %s2379_s15 }
  0x88   : > { %v1386_v41 = vld [vmem:[%s306_s18] sm:$0x7]  ;;  %p1821_p13 = pneg %p1820_p12 }
  0x89   : > { %v1387_v50 = vadd.f32 0.5, %v1386_v41  ;;  %1041 = vperm.xlu1 %1796, %v1036_v38  }
  0x8b   : > { %v2404_v29 = vmul.f32 2.0, %v1387_v50  ;;  %1046 = vperm.xlu0 %1797, %v1037_v45  }
  0x8d   : > { %v803_v3 = vpop.permute.xlu1 %802  ;;  %v801_v8 = vpop.permute.xlu0 %800  ;;  %1389 = vst [vmem:[%s310_s20] sm:$0x7] %v2404_v29  ;;  %s1892_s20 = smov [#allocation3]  }
  0x8e   : > { %v817_v36 = vrot.slane %v803_v3, 4  ;;  %v816_v55 = vrot.slane %v801_v8, 4  ;;  %s1822_s21 = sshll.u32 %s1892_s20, 4  ;;  %s1823_s21 = int_to_ptr.vmem [resolvable:$false] %s1822_s21 }
  0x8f   : > { %s1824_s22 = scalar_lea.vmem %s1823_s21, 2304  ;;  %p1825_p0 = scmp.lt.s32.totalorder %s2668_s16, %s1823_s21 }
  0x90   : > { %v827_v56 = vsel %vm2726_vm6, %v803_v3, %v817_v36  ;;  %v824_v9 = vsel %vm423_vm11, %v816_v55, %v817_v36  ;;  %v1038_v55 = vld [vmem:[%s2719_s2 + $0x10] sm:$0xff]  ;;  %p1826_p1 = scmp.lt.s32.totalorder %s1824_s22, %s1818_s19 }
  0x91   : > { %846 = vst [vmem:[#allocation2 + $0xbc] sm:$0x8] %v827_v56  ;;  %v826_v10 = vsel %vm2726_vm6, %v801_v8, %v824_v9  ;;  %v663_v47 = vpop.permute.xlu0 %662  ;;  %vm770_vm6 = vsmask.f32 7954  ;;  %v534_v56 = vld [vmem:[#allocation2 + $0x5c] sm:$0xf]  ;;  %1051 = vperm.xlu1 %1796, %v1038_v55  }
  0x92   : > { %845 = vst [vmem:[#allocation2 + $0xb4] sm:$0x88] %v826_v10  ;;  %v672_v54 = vrot.slane %v663_v47, 4  ;;  %p1827_p2 = por %p1826_p1, %p1825_p0 }
  0x93   : > { %v739_v39 = vpop.permute.xlu1 %738 }
  0x94   : > { %v748_v58 = vrot.slane %v739_v39, 4  ;;  %p1828_p3 = pnand %p1827_p2, %p1821_p13 }
  0x95   : > { %v665_v57 = vpop.permute.xlu0 %664 }
  0x96   : > { %v673_v13 = vrot.slane %v665_v57, 4 }
  0x97   : > { %v741_v62 = vpop.permute.xlu1 %740 }
  0x98   : > { %v684_v63 = vsel %vm423_vm11, %v672_v54, %v673_v13  ;;  %v686_v5 = vsel %vm675_vm14, %v665_v57, %v673_v13  ;;  %v749_v60 = vrot.slane %v741_v62, 4 }
  0x99   : > { %v685_v25 = vsel %vm675_vm14, %v663_v47, %v684_v63  ;;  %v710_v26 = vsel %vm2054_vm7, %v686_v5, %v709_v61  ;;  %v743_v18 = vpop.permute.xlu0 %742  ;;  %vm2373_vm7 = vmand %vm527_vm5, %vm770_vm6  ;;  %vm528_vm6 = vsmask.f32 7424 }
  0x9a   : > { %v707_v31 = vsel %vm705_vm8, %v685_v25, %v706_v20  ;;  %711 = vst [vmem:[#allocation2 + $0xa4] sm:$0x1] %v710_v26  ;;  %v756_v33 = vsel %vm423_vm11, %v748_v58, %v749_v60  ;;  %v758_v49 = vsel %vm753_vm1, %v741_v62, %v749_v60  ;;  %v750_v15 = vrot.slane %v743_v18, 4  ;;  %vm772_vm8 = vmor %vm2373_vm7, %vm2366_vm4 }
  0x9b   : > { %708 = vst [vmem:[#allocation2 + $0x9c] sm:$0x11] %v707_v31  ;;  %v2363_v21 = vsel %vm753_vm1, %v739_v39, %v756_v33  ;;  %780 = vst [vmem:[#allocation2 + $0xb0] sm:$0xf] %v758_v49  ;;  %v745_v19 = vpop.permute.xlu1 %744  ;;  %v531_v39 = vld [vmem:[#allocation2 + $0x54] sm:$0xff]  ;;  %vm612_vm7 = vcmask 1043459  }
  0x9c   : > { %v751_v14 = vrot.slane %v745_v19, 4  ;;  %vm2416_vm13 = vmand %vm527_vm5, %vm528_vm6  ;;  %vm615_vm6 = vcmask 1047559  }
  0x9d   : > { %v735_v59 = vpop.permute.xlu0 %734  ;;  %vm530_vm5 = vmor %vm2416_vm13, %vm2400_vm3 }
  0x9e   : > { %v759_v53 = vsel %vm423_vm11, %v750_v15, %v751_v14  ;;  %v761_v23 = vsel %vm753_vm1, %v745_v19, %v751_v14  ;;  %v746_v24 = vrot.slane %v735_v59, 4 }
  0x9f   : > { %v760_v17 = vsel %vm753_vm1, %v743_v18, %v759_v53  ;;  %782 = vst [vmem:[#allocation2 + $0xbc] sm:$0x7] %v761_v23  ;;  %v737_v34 = vpop.permute.xlu1 %736 }
  0xa0   : > { %781 = vst [vmem:[#allocation2 + $0xb4] sm:$0x77] %v760_v17  ;;  %v747_v35 = vrot.slane %v737_v34, 4 }
  0xa1   : > { %v776_v27 = vld [vmem:[#allocation2 + $0xa4] sm:$0xf]  ;;  %v659_v46 = vpop.permute.xlu0 %658 }
  0xa2   : > { %v773_v51 = vld [vmem:[#allocation2 + $0x9c] sm:$0xff]  ;;  %v752_v37 = vsel %vm423_vm11, %v746_v24, %v747_v35  ;;  %v755_v48 = vsel %vm753_vm1, %v737_v34, %v747_v35  ;;  %v670_v7 = vrot.slane %v659_v46, 4 }
  0xa3   : > { %v754_v12 = vsel %vm753_vm1, %v735_v59, %v752_v37  ;;  %v777_v44 = vsel %vm2366_vm4, %v755_v48, %v776_v27  ;;  %v661_v52 = vpop.permute.xlu1 %660  ;;  %vm506_vm1 = vcmask 1031168   ;;  %vm592_vm4 = vcmask 900096  }
  0xa4   : > { %v774_v42 = vsel %vm772_vm8, %v754_v12, %v773_v51  ;;  %778 = vst [vmem:[#allocation2 + $0xa4] sm:$0xf] %v777_v44  ;;  %v671_v2 = vrot.slane %v661_v52, 4  ;;  %vm613_vm8 = vsmask.f32 7950 }
  0xa5   : > { %775 = vst [vmem:[#allocation2 + $0x9c] sm:$0xff] %v774_v42  ;;  %v496_v11 = vpop.permute.xlu0 %495 }
  0xa6   : > { %v681_v1 = vsel %vm423_vm11, %v670_v7, %v671_v2  ;;  %v683_v4 = vsel %vm675_vm14, %v661_v52, %v671_v2  ;;  %v503_v6 = vrot.slane %v496_v11, 4  ;;  %v1798_v0 = vld [vmem:[#allocation2 + $0xb0] ss:$12 sps:$4 sm:$0xff]  }
  0xa7   : > { %v682_v3 = vsel %vm675_vm14, %v659_v46, %v681_v1  ;;  %700 = vst [vmem:[#allocation2 + $0x98] sm:$0xf] %v683_v4  ;;  %v498_v8 = vpop.permute.xlu1 %497  ;;  %v1018_v36 = vld [vmem:[#allocation2 + $0xb4] sm:$0xff]  ;;  %1330 = vmatpush1.bf16.msra.mxu1 %v1798_v0 }
  0xa8   : > { %v504_v9 = vrot.slane %v498_v8, 4  ;;  %v1662_v10 = vcombine.high %v2363_v21, %v1018_v36  ;;  %v1661_v47 = vcombine.low %v2363_v21, %v1018_v36  ;;  %1331 = vmatprep.subr.bf16.mxu1 %v1885_v43  ;;  %v1659_v13 = vcombine.high %v682_v3, %v774_v42 }
  0xa9   : > { %v580_v57 = vpop.permute.xlu0 %579  ;;  %v1658_v26 = vcombine.low %v682_v3, %v774_v42 }
  0xaa   : > { %v512_v54 = vsel %vm423_vm11, %v503_v6, %v504_v9  ;;  %v514_v58 = vsel %vm506_vm1, %v498_v8, %v504_v9  ;;  %1278 = vmatprep.subr.bf16.mxu0 %v1662_v10  ;;  %v589_v61 = vrot.slane %v580_v57, 4 }
  0xab   : > { %v513_v20 = vsel %vm506_vm1, %v496_v11, %v512_v54  ;;  %v535_v62 = vsel %vm2400_vm3, %v514_v58, %v534_v56  ;;  %1279 = vmatpush1.bf16.msra.mxu0 %v1661_v47  ;;  %v582_v63 = vpop.permute.xlu1 %581  ;;  %vm616_vm3 = vsmask.f32 7966 }
  0xac   : > { %v532_v5 = vsel %vm530_vm5, %v513_v20, %v531_v39  ;;  %536 = vst [vmem:[#allocation2 + $0x5c] sm:$0xf] %v535_v62  ;;  %v590_v60 = vrot.slane %v582_v63, 4  ;;  %1280 = vmatprep.subr.bf16.mxu0 %v1659_v13  ;;  %vm2456_vm13 = vmand %vm615_vm6, %vm616_vm3  ;;  %vm448_vm6 = vcmask 1047558   ;;  %vm449_vm3 = vsmask.f32 7962 }
  0xad   : > { %533 = vst [vmem:[#allocation2 + $0x54] sm:$0xff] %v532_v5  ;;  %v651_v25 = vpop.permute.xlu0 %650 }
  0xae   : > { %v601_v18 = vsel %vm423_vm11, %v589_v61, %v590_v60  ;;  %v603_v31 = vsel %vm592_vm4, %v582_v63, %v590_v60  ;;  %v666_v33 = vrot.slane %v651_v25, 4  ;;  %v1799_v49 = vld [vmem:[#allocation2 + $0x98] ss:$12 sps:$4 sm:$0xff]  }
  0xaf   : > { %v602_v15 = vsel %vm592_vm4, %v580_v57, %v601_v18  ;;  %630 = vst [vmem:[#allocation2 + $0x80] sm:$0x3] %v603_v31  ;;  %v653_v21 = vpop.permute.xlu1 %652  ;;  %1281 = vmatpush1.bf16.msra.mxu0 %v1658_v26  ;;  %1332 = vmatpush1.bf16.msra.mxu1 %v1799_v49 }
  0xb0   : > { %629 = vst [vmem:[#allocation2 + $0x78] sm:$0x33] %v602_v15  ;;  %v667_v19 = vrot.slane %v653_v21, 4  ;;  %1333 = vmatprep.subr.bf16.mxu1 %v1885_v43 }
  0xb1   : > { %v655_v14 = vpop.permute.xlu0 %654 }
  0xb2   : > { %v674_v59 = vsel %vm423_vm11, %v666_v33, %v667_v19  ;;  %v677_v22 = vsel %vm675_vm14, %v653_v21, %v667_v19  ;;  %v668_v53 = vrot.slane %v655_v14, 4 }
  0xb3   : > { %v676_v23 = vsel %vm675_vm14, %v651_v25, %v674_v59  ;;  %696 = vst [vmem:[#allocation2 + $0x80] sm:$0xc] %v677_v22  ;;  %v657_v24 = vpop.permute.xlu1 %656  ;;  %v622_v39 = vld [vmem:[#allocation2 + $0x5c] sm:$0x8] }
  0xb4   : > { %695 = vst [vmem:[#allocation2 + $0x78] sm:$0xcc] %v676_v23  ;;  %v669_v28 = vrot.slane %v657_v24, 4  ;;  %v619_v61 = vld [vmem:[#allocation2 + $0x54] sm:$0x88] }
  0xb5   : > { %v572_v17 = vpop.permute.xlu0 %571 }
  0xb6   : > { %v678_v34 = vsel %vm423_vm11, %v668_v53, %v669_v28  ;;  %v680_v35 = vsel %vm675_vm14, %v657_v24, %v669_v28  ;;  %v585_v27 = vrot.slane %v572_v17, 4 }
  0xb7   : > { %v679_v46 = vsel %vm675_vm14, %v655_v14, %v678_v34  ;;  %698 = vst [vmem:[#allocation2 + $0x8c] sm:$0xf] %v680_v35  ;;  %v574_v51 = vpop.permute.xlu1 %573  ;;  %vm2450_vm14 = vmand %vm612_vm7, %vm613_vm8  ;;  %vm425_vm7 = vcmask 1039360   ;;  %vm446_vm8 = vsmask.f32 7946 }
  0xb8   : > { %v586_v37 = vrot.slane %v574_v51, 4  ;;  %vm618_vm5 = vmor %vm2456_vm13, %vm2450_vm14 }
  0xb9   : > { %v576_v48 = vpop.permute.xlu0 %575  ;;  %vm2493_vm13 = vmand %vm448_vm6, %vm449_vm3  ;;  %vm924_vm6 = vcmask 1043457   ;;  %vm925_vm3 = vsmask.f32 7942 }
  0xba   : > { %v595_v7 = vsel %vm423_vm11, %v585_v27, %v586_v37  ;;  %v597_v41 = vsel %vm592_vm4, %v574_v51, %v586_v37  ;;  %v587_v12 = vrot.slane %v576_v48, 4 }
  0xbb   : > { %v596_v44 = vsel %vm592_vm4, %v572_v17, %v595_v7  ;;  %626 = vst [vmem:[#allocation2 + $0x68] sm:$0xf] %v597_v41  ;;  %v578_v52 = vpop.permute.xlu1 %577  ;;  %v1008_v50 = vld [vmem:[#allocation2 + $0x78] sm:$0xff] }
  0xbc   : > { %v588_v42 = vrot.slane %v578_v52, 4  ;;  %v1656_v2 = vcombine.high %v1008_v50, %v679_v46  ;;  %v1655_v11 = vcombine.low %v1008_v50, %v679_v46 }
  0xbd   : > { %v1793_v38 = vpop.permute.xlu0 %1792 }
  0xbe   : > { %v598_v45 = vsel %vm423_vm11, %v587_v12, %v588_v42  ;;  %v600_v1 = vsel %vm592_vm4, %v578_v52, %v588_v42  ;;  %v1795_v6 = vunpack.i.h.bf16 %v1793_v38  ;;  %v1794_v30 = vunpack.i.l.bf16 %v1793_v38  ;;  %v1800_v0 = vld [vmem:[#allocation2 + $0x80] ss:$12 sps:$4 sm:$0xff]   ;;  %1282 = vmatprep.subr.bf16.mxu0 %v1656_v2 }
  0xbf   : > { %v599_v3 = vsel %vm592_vm4, %v576_v48, %v598_v45  ;;  %628 = vst [vmem:[#allocation2 + $0x74] sm:$0xf] %v600_v1  ;;  %v492_v8 = vpop.permute.xlu1 %491  ;;  %1283 = vmatpush1.bf16.msra.mxu0 %v1655_v11  ;;  %1334 = vmatpush1.bf16.msra.mxu1 %v1800_v0  ;;  %v455_v2 = vld [vmem:[#allocation2 + $0x20] sm:$0xc] }
  0xc0   : > { %v584_v36 = vrot.slane %v1795_v6, 4  ;;  %v583_v55 = vrot.slane %v1794_v30, 4  ;;  %v501_v56 = vrot.slane %v492_v8, 4  ;;  %v1653_v9 = vcombine.high %v596_v44, %v599_v3  ;;  %1335 = vmatprep.subr.bf16.mxu1 %v1885_v43 }
  0xc1   : > { %v494_v10 = vpop.permute.xlu0 %493  ;;  %v1652_v47 = vcombine.low %v596_v44, %v599_v3 }
  0xc2   : > { %v594_v57 = vsel %vm592_vm4, %v1795_v6, %v584_v36  ;;  %v591_v54 = vsel %vm423_vm11, %v583_v55, %v584_v36  ;;  %v502_v58 = vrot.slane %v494_v10, 4  ;;  %1284 = vmatprep.subr.bf16.mxu0 %v1653_v9 }
  0xc3   : > { %v623_v13 = vsel %vm2450_vm14, %v594_v57, %v622_v39  ;;  %v593_v20 = vsel %vm592_vm4, %v1794_v30, %v591_v54  ;;  %v408_v62 = vpop.permute.xlu1 %407  ;;  %1285 = vmatpush1.bf16.msra.mxu0 %v1652_v47  ;;  %vm445_vm4 = vcmask 1043458   ;;  %v982_v54 = vld [vmem:[#allocation2 + $0x11c] sm:$0x7] }
  0xc4   : > { %624 = vst [vmem:[#allocation2 + $0x5c] sm:$0x8] %v623_v13  ;;  %v620_v63 = vsel %vm618_vm5, %v593_v20, %v619_v61  ;;  %v509_v5 = vsel %vm423_vm11, %v501_v56, %v502_v58  ;;  %v511_v60 = vsel %vm506_vm1, %v494_v10, %v502_v58  ;;  %v419_v25 = vrot.slane %v408_v62, 4  ;;  %vm2485_vm14 = vmand %vm445_vm4, %vm446_vm8  ;;  %v979_v20 = vld [vmem:[#allocation2 + $0x114] sm:$0x77] }
  0xc5   : > { %621 = vst [vmem:[#allocation2 + $0x54] sm:$0x88] %v620_v63  ;;  %v510_v26 = vsel %vm506_vm1, %v492_v8, %v509_v5  ;;  %524 = vst [vmem:[#allocation2 + $0x50] sm:$0xf] %v511_v60  ;;  %v410_v18 = vpop.permute.xlu0 %409  ;;  %vm853_vm4 = vsmask.f32 5376 }
  0xc6   : > { %v420_v31 = vrot.slane %v410_v18, 4  ;;  %v1801_v33 = vld [vmem:[#allocation2 + $0x68] ss:$12 sps:$4 sm:$0xff]   ;;  %vm451_vm5 = vmor %vm2493_vm13, %vm2485_vm14  ;;  %vm928_vm13 = vsmask.f32 7958 }
  0xc7   : > { %v412_v49 = vpop.permute.xlu1 %411  ;;  %1336 = vmatpush1.bf16.msra.mxu1 %v1801_v33  ;;  %vm2514_vm8 = vmand %vm631_vm9, %vm851_vm15  ;;  %vm2769_vm15 = vcmask 752640  }
  0xc8   : > { %v431_v15 = vsel %vm423_vm11, %v419_v25, %v420_v31  ;;  %v433_v21 = vsel %vm425_vm7, %v410_v18, %v420_v31  ;;  %v421_v19 = vrot.slane %v412_v49, 4  ;;  %1337 = vmatprep.subr.bf16.mxu1 %v1885_v43  ;;  %vm2770_vm0 = vmmov %vm2769_vm15 }
  0xc9   : > { %v2477_v14 = vsel %vm425_vm7, %v408_v62, %v431_v15  ;;  %461 = vst [vmem:[#allocation2 + $0x38] sm:$0xf] %v433_v21  ;;  %v414_v59 = vpop.permute.xlu0 %413  ;;  %v859_v15 = vld [vmem:[#allocation2 + $0xe0] sm:$0x3] }
  0xca   : > { %v422_v22 = vrot.slane %v414_v59, 4 }
  0xcb   : > { %v488_v53 = vpop.permute.xlu1 %487 }
  0xcc   : > { %v434_v23 = vsel %vm423_vm11, %v421_v19, %v422_v22  ;;  %v436_v24 = vsel %vm425_vm7, %v414_v59, %v422_v22  ;;  %v499_v28 = vrot.slane %v488_v53, 4  ;;  %v1802_v17 = vld [vmem:[#allocation2 + $0x50] ss:$12 sps:$4 sm:$0xff]   ;;  %v1002_v34 = vld [vmem:[#allocation2 + $0x54] sm:$0xff] }
  0xcd   : > { %v435_v35 = vsel %vm425_vm7, %v412_v49, %v434_v23  ;;  %463 = vst [vmem:[#allocation2 + $0x44] sm:$0x1] %v436_v24  ;;  %v490_v27 = vpop.permute.xlu0 %489  ;;  %v1650_v46 = vcombine.high %v510_v26, %v1002_v34  ;;  %v1649_v51 = vcombine.low %v510_v26, %v1002_v34  ;;  %1338 = vmatpush1.bf16.msra.mxu1 %v1802_v17  ;;  %v1806_v23 = vld [vmem:[#allocation2 + $0x4] ss:$12 sps:$4 sm:$0xff]  }
  0xce   : > { %462 = vst [vmem:[#allocation2 + $0x3c] sm:$0x11] %v435_v35  ;;  %v500_v37 = vrot.slane %v490_v27, 4  ;;  %1339 = vmatprep.subr.bf16.mxu1 %v1885_v43 }
  0xcf   : > { %1286 = vmatprep.subr.bf16.mxu0 %v1650_v46  ;;  %v400_v7 = vpop.permute.xlu1 %399 }
  0xd0   : > { %v505_v41 = vsel %vm423_vm11, %v499_v28, %v500_v37  ;;  %v508_v12 = vsel %vm506_vm1, %v490_v27, %v500_v37  ;;  %1287 = vmatpush1.bf16.msra.mxu0 %v1649_v51  ;;  %v415_v52 = vrot.slane %v400_v7, 4  ;;  %v1805_v51 = vld [vmem:[#allocation2 + $0x8] ss:$12 sps:$4 sm:$0xff]   ;;  %v1808_v37 = vld [vmem:[#allocation2] ss:$12 sps:$4 sm:$0xff]  }
  0xd1   : > { %v507_v50 = vsel %vm506_vm1, %v488_v53, %v505_v41  ;;  %522 = vst [vmem:[#allocation2 + $0x44] sm:$0xe] %v508_v12  ;;  %v402_v42 = vpop.permute.xlu0 %401  ;;  %vm960_vm1 = vcmask 736256  }
  0xd2   : > { %521 = vst [vmem:[#allocation2 + $0x3c] sm:$0xee] %v507_v50  ;;  %v416_v11 = vrot.slane %v402_v42, 4 }
  0xd3   : > { %v404_v38 = vpop.permute.xlu1 %403 }
  0xd4   : > { %v427_v45 = vsel %vm425_vm7, %v402_v42, %v416_v11  ;;  %v424_v1 = vsel %vm423_vm11, %v415_v52, %v416_v11  ;;  %v417_v4 = vrot.slane %v404_v38, 4 }
  0xd5   : > { %v456_v6 = vsel %vm2485_vm14, %v427_v45, %v455_v2  ;;  %v426_v30 = vsel %vm425_vm7, %v400_v7, %v424_v1  ;;  %v406_v0 = vpop.permute.xlu0 %405  ;;  %v1889_v7 = vmov 65535   ;;  %vm927_vm14 = vcmask 1047557  }
  0xd6   : > { %457 = vst [vmem:[#allocation2 + $0x20] sm:$0xc] %v456_v6  ;;  %v453_v3 = vsel %vm451_vm5, %v426_v30, %v452_v40  ;;  %v418_v8 = vrot.slane %v406_v0, 4  ;;  %vm2559_vm5 = vmand %vm924_vm6, %vm925_vm3 }
  0xd7   : > { %454 = vst [vmem:[#allocation2 + $0x18] sm:$0xcc] %v453_v3  ;;  %v950_v36 = vpop.permute.xlu1 %949 }
  0xd8   : > { %v430_v55 = vsel %vm425_vm7, %v406_v0, %v418_v8  ;;  %v428_v56 = vsel %vm423_vm11, %v417_v4, %v418_v8  ;;  %v957_v9 = vrot.slane %v950_v36, 4  ;;  %v1803_v10 = vld [vmem:[#allocation2 + $0x38] ss:$12 sps:$4 sm:$0xff]  }
  0xd9   : > { %459 = vst [vmem:[#allocation2 + $0x2c] sm:$0xf] %v430_v55  ;;  %v429_v47 = vsel %vm425_vm7, %v404_v38, %v428_v56  ;;  %v952_v39 = vpop.permute.xlu0 %951  ;;  %v998_v57 = vld [vmem:[#allocation2 + $0x3c] sm:$0xff]  ;;  %1340 = vmatpush1.bf16.msra.mxu1 %v1803_v10  ;;  %vm2522_vm7 = vmand %vm632_vm10, %vm853_vm4  ;;  %vm1265_vm10 = vcmask 1045504   ;;  %v1396_v56 = vld [vmem:[%s2720_s3 + $0x30] sm:$0xff] }
  0xda   : > { %v958_v58 = vrot.slane %v952_v39, 4  ;;  %v1647_v61 = vcombine.high %v2477_v14, %v998_v57  ;;  %v1646_v13 = vcombine.low %v2477_v14, %v998_v57  ;;  %1341 = vmatprep.subr.bf16.mxu1 %v1885_v43  ;;  %vm855_vm9 = vmor %vm2522_vm7, %vm2514_vm8  ;;  %v856_v14 = vld [vmem:[#allocation2 + $0xd8] sm:$0x33]  ;;  %v1267_v41 = vsel %vm1265_vm10, 4294967295, %v1889_v7 }
  0xdb   : > { %v813_v63 = vpop.permute.xlu1 %812  ;;  %vm2565_vm4 = vmand %vm927_vm14, %vm928_vm13 }
  0xdc   : > { %v968_v5 = vsel %vm960_vm1, %v952_v39, %v958_v58  ;;  %v966_v60 = vsel %vm423_vm11, %v957_v9, %v958_v58  ;;  %1288 = vmatprep.subr.bf16.mxu0 %v1647_v61  ;;  %v822_v26 = vrot.slane %v813_v63, 4  ;;  %vm2776_vm7 = vmmov %vm2770_vm0  ;;  %v1392_v39 = vld [vmem:[%s2720_s3 + $0x10] sm:$0xff] }
  0xdd   : > { %v983_v18 = vsel %vm2280_vm2, %v968_v5, %v982_v54  ;;  %v967_v31 = vsel %vm960_vm1, %v950_v36, %v966_v60  ;;  %v815_v33 = vpop.permute.xlu0 %814  ;;  %1289 = vmatpush1.bf16.msra.mxu0 %v1646_v13  ;;  %vm1266_vm2 = vcmask 1046528   ;;  %vm2778_vm10 = vmmov %vm2770_vm0 }
  0xde   : > { %984 = vst [vmem:[#allocation2 + $0x11c] sm:$0x7] %v983_v18  ;;  %v980_v49 = vsel %vm332_vm12, %v967_v31, %v979_v20  ;;  %v823_v21 = vrot.slane %v815_v33, 4  ;;  %v992_v19 = vld [vmem:[#allocation2 + $0x18] sm:$0xff]  ;;  %vm909_vm12 = vcmask 744448   ;;  %v1268_v11 = vsel %vm1266_vm2, %v1267_v41, 0 }
  0xdf   : > { %981 = vst [vmem:[#allocation2 + $0x114] sm:$0x77] %v980_v49  ;;  %v946_v59 = vpop.permute.xlu1 %945  ;;  %v1644_v22 = vcombine.high %v992_v19, %v429_v47  ;;  %v1643_v53 = vcombine.low %v992_v19, %v429_v47 }
  0xe0   : > { %v836_v32 = vsel %vm2769_vm15, %v815_v33, %v823_v21  ;;  %v834_v16 = vsel %vm423_vm11, %v822_v26, %v823_v21  ;;  %v955_v24 = vrot.slane %v946_v59, 4  ;;  %v1804_v28 = vld [vmem:[#allocation2 + $0x20] ss:$12 sps:$4 sm:$0xff]  }
  0xe1   : > { %v860_v17 = vsel %vm2514_vm8, %v836_v32, %v859_v15  ;;  %v835_v34 = vsel %vm2770_vm0, %v813_v63, %v834_v16  ;;  %v948_v35 = vpop.permute.xlu0 %947  ;;  %1290 = vmatprep.subr.bf16.mxu0 %v1644_v22  ;;  %1342 = vmatpush1.bf16.msra.mxu1 %v1804_v28  ;;  %vm930_vm8 = vmor %vm2565_vm4, %vm2559_vm5 }
  0xe2   : > { %861 = vst [vmem:[#allocation2 + $0xe0] sm:$0x3] %v860_v17  ;;  %v857_v27 = vsel %vm855_vm9, %v835_v34, %v856_v14  ;;  %v956_v46 = vrot.slane %v948_v35, 4  ;;  %1291 = vmatpush1.bf16.msra.mxu0 %v1643_v53  ;;  %1343 = vmatprep.subr.bf16.mxu1 %v1885_v43  ;;  %vm2777_vm9 = vmmov %vm2770_vm0 }
  0xe3   : > { %858 = vst [vmem:[#allocation2 + $0xd8] sm:$0x33] %v857_v27  ;;  %v899_v48 = vpop.permute.xlu1 %898  ;;  %1292 = vmatprep.subr.bf16.mxu0 %v1806_v23 }
  0xe4   : > { %v965_v12 = vsel %vm960_vm1, %v948_v35, %v956_v46  ;;  %v963_v44 = vsel %vm423_vm11, %v955_v24, %v956_v46  ;;  %v906_v52 = vrot.slane %v899_v48, 4 }
  0xe5   : > { %978 = vst [vmem:[#allocation2 + $0x110] sm:$0xf] %v965_v12  ;;  %v964_v50 = vsel %vm960_vm1, %v946_v59, %v963_v44  ;;  %v901_v42 = vpop.permute.xlu0 %900  ;;  %1344 = vmatpush1.bf16.msra.mxu1 %v1805_v51 }
  0xe6   : > { %v907_v2 = vrot.slane %v901_v42, 4  ;;  %1293 = vmatpush1.bf16.msra.mxu0 %v1808_v37  ;;  %v1034_v40 = vld [vmem:[#allocation2 + $0x114] sm:$0x77]  ;;  %1353 = vmatprep.subr.bf16.mxu1 %v1885_v43 }
  0xe7   : > { %v942_v38 = vpop.permute.xlu1 %941  ;;  %v1674_v45 = vcombine.high %v964_v50, %v1034_v40  ;;  %v1673_v1 = vcombine.low %v964_v50, %v1034_v40  ;;  %v1890_v40 = vmov 0.0  }
  0xe8   : > { %v917_v4 = vsel %vm909_vm12, %v901_v42, %v907_v2  ;;  %v915_v6 = vsel %vm423_vm11, %v906_v52, %v907_v2  ;;  %v953_v30 = vrot.slane %v942_v38, 4  ;;  %v987_v2 = vld [vmem:[%s2718_s1 + $0x10] sm:$0xff] }
  0xe9   : > { %940 = vst [vmem:[#allocation2 + $0xf8] sm:$0xf] %v917_v4  ;;  %v916_v0 = vsel %vm909_vm12, %v899_v48, %v915_v6  ;;  %v944_v3 = vpop.permute.xlu0 %943  ;;  %v1273_v8 = vand.u32 %v1674_v45, %v1268_v11  ;;  %v1270_v36 = vand.u32 %v1673_v1, %v1268_v11  ;;  %v934_v60 = vld [vmem:[#allocation2 + $0xe0] sm:$0xe]  ;;  %v1639_v45 = vcombine.high %v987_v2, %v987_v2  ;;  %v1403_v4 = vld [vmem:[%s2720_s3 + $0x68] sm:$0xff] }
  0xea   : > { %v954_v55 = vrot.slane %v944_v3, 4  ;;  %v931_v33 = vld [vmem:[#allocation2 + $0xd8] sm:$0xee]  ;;  %v1402_v6 = vld [vmem:[%s2720_s3 + $0x60] sm:$0xff] }
  0xeb   : > { %v891_v9 = vpop.permute.xlu1 %890  ;;  %1302 = vmatprep.subr.bf16.mxu0 %v1273_v8  ;;  %v1399_v8 = vld [vmem:[%s2720_s3 + $0x48] sm:$0xff] }
  0xec   : > { %v962_v10 = vsel %vm960_vm1, %v944_v3, %v954_v55  ;;  %v959_v47 = vsel %vm423_vm11, %v953_v30, %v954_v55  ;;  %v902_v57 = vrot.slane %v891_v9, 4  ;;  %v1809_v54 = vld [vmem:[#allocation2 + $0x110] ss:$12 sps:$4 sm:$0x7f]   ;;  %1303 = vmatpush2.bf16.msra.mxu0 %v1270_v36  ;;  %v1638_v30 = vcombine.low %v987_v2, %v987_v2  ;;  %v1398_v36 = vld [vmem:[%s2720_s3 + $0x40] sm:$0xff] }
  0xed   : > { %976 = vst [vmem:[#allocation2 + $0x104] sm:$0xf] %v962_v10  ;;  %v961_v58 = vsel %vm960_vm1, %v942_v38, %v959_v47  ;;  %v893_v61 = vpop.permute.xlu0 %892  ;;  %v1276_v20 = vand.u32 %v1809_v54, %v1268_v11  ;;  %vm2775_vm1 = vmmov %vm2770_vm0  ;;  %v1813_v11 = vld [vmem:[%s2718_s1] ss:$8 sps:$4 sm:$0xff]   ;;  %v1405_v38 = vld [vmem:[%s2720_s3 + $0x78] sm:$0xff]  ;;  %vm1891_vm0 = vmmov 0  }
  0xee   : > { %v903_v13 = vrot.slane %v893_v61, 4  ;;  %v1671_v62 = vcombine.high %v916_v0, %v961_v58  ;;  %v1670_v63 = vcombine.low %v916_v0, %v961_v58  ;;  %v1401_v0 = vld [vmem:[%s2720_s3 + $0x58] sm:$0xff]  ;;  %v1400_v3 = vld [vmem:[%s2720_s3 + $0x50] sm:$0xff]  ;;  %v1394_v10 = vld [vmem:[%s2720_s3 + $0x20] sm:$0xff] }
  0xef   : > { %v895_v5 = vpop.permute.xlu1 %894  ;;  %1354 = vmatpush2.bf16.msra.mxu1 %v1276_v20  ;;  %v1397_v55 = vld [vmem:[%s2720_s3 + $0x38] sm:$0xff]  ;;  %v1390_v54 = vld [vmem:[%s2720_s3] sm:$0xff] }
  0xf0   : > { %v911_v25 = vsel %vm909_vm12, %v893_v61, %v903_v13  ;;  %v908_v26 = vsel %vm423_vm11, %v902_v57, %v903_v13  ;;  %v904_v18 = vrot.slane %v895_v5, 4  ;;  %1304 = vmatprep.subr.bf16.mxu0 %v1671_v62  ;;  %1355 = vmatprep.subr.bf16.mxu1 %v1885_v43  ;;  %v1393_v47 = vld [vmem:[%s2720_s3 + $0x18] sm:$0xff]  ;;  %v1391_v57 = vld [vmem:[%s2720_s3 + $0x8] sm:$0xff] }
  0xf1   : > { %v935_v31 = vsel %vm2559_vm5, %v911_v25, %v934_v60  ;;  %v910_v49 = vsel %vm909_vm12, %v891_v9, %v908_v26  ;;  %v897_v15 = vpop.permute.xlu0 %896  ;;  %1305 = vmatpush2.bf16.msra.mxu0 %v1670_v63  ;;  %v1395_v9 = vld [vmem:[%s2720_s3 + $0x28] sm:$0xff] }
  0xf2   : > { %936 = vst [vmem:[#allocation2 + $0xe0] sm:$0xe] %v935_v31  ;;  %v932_v21 = vsel %vm930_vm8, %v910_v49, %v931_v33  ;;  %v905_v19 = vrot.slane %v897_v15, 4 }
  0xf3   : > { %933 = vst [vmem:[#allocation2 + $0xd8] sm:$0xee] %v932_v21  ;;  %v805_v14 = vpop.permute.xlu1 %804 }
  0xf4   : > { %v914_v59 = vsel %vm909_vm12, %v897_v15, %v905_v19  ;;  %v912_v22 = vsel %vm423_vm11, %v904_v18, %v905_v19  ;;  %v818_v53 = vrot.slane %v805_v14, 4  ;;  %v1810_v23 = vld [vmem:[#allocation2 + $0xf8] ss:$12 sps:$4 sm:$0xff]  }
  0xf5   : > { %938 = vst [vmem:[#allocation2 + $0xec] sm:$0xf] %v914_v59  ;;  %v913_v32 = vsel %vm909_vm12, %v895_v5, %v912_v22  ;;  %v807_v16 = vpop.permute.xlu0 %806  ;;  %1356 = vmatpush2.bf16.msra.mxu1 %v1810_v23 }
  0xf6   : > { %v819_v24 = vrot.slane %v807_v16, 4  ;;  %1357 = vmatprep.subr.bf16.mxu1 %v1885_v43 }
  0xf7   : > { %v809_v28 = vpop.permute.xlu1 %808 }
  0xf8   : > { %v830_v17 = vsel %vm2775_vm1, %v807_v16, %v819_v24  ;;  %v828_v34 = vsel %vm423_vm11, %v818_v53, %v819_v24  ;;  %v820_v35 = vrot.slane %v809_v28, 4 }
  0xf9   : > { %848 = vst [vmem:[#allocation2 + $0xc8] sm:$0xf] %v830_v17  ;;  %v829_v27 = vsel %vm2776_vm7, %v805_v14, %v828_v34  ;;  %v811_v46 = vpop.permute.xlu0 %810 }
  0xfa   : > { %v821_v51 = vrot.slane %v811_v46, 4  ;;  %v1024_v37 = vld [vmem:[#allocation2 + $0xd8] sm:$0xff] }
  0xfb   : > { %v1668_v48 = vcombine.high %v1024_v37, %v913_v32  ;;  %v1667_v7 = vcombine.low %v1024_v37, %v913_v32 }
  0xfc   : > { %v833_v41 = vsel %vm2777_vm9, %v811_v46, %v821_v51  ;;  %v831_v12 = vsel %vm423_vm11, %v820_v35, %v821_v51  ;;  %v1811_v44 = vld [vmem:[#allocation2 + $0xe0] ss:$12 sps:$4 sm:$0xff]   ;;  %vm2779_vm11 = vcmask 498688  }
  0xfd   : > { %850 = vst [vmem:[#allocation2 + $0xd4] sm:$0xf] %v833_v41  ;;  %v832_v52 = vsel %vm2778_vm10, %v809_v28, %v831_v12  ;;  %1306 = vmatprep.subr.bf16.mxu0 %v1668_v48  ;;  %1358 = vmatpush2.bf16.msra.mxu1 %v1811_v44  ;;  %vm2780_vm15 = vmmov %vm2779_vm11 }
  0xfe   : > { %1307 = vmatpush2.bf16.msra.mxu0 %v1667_v7  ;;  %v1665_v50 = vcombine.high %v829_v27, %v832_v52  ;;  %1359 = vmatprep.subr.bf16.mxu1 %v1885_v43  ;;  %v1664_v42 = vcombine.low %v829_v27, %v832_v52  ;;  %v1404_v43 = vld [vmem:[%s2720_s3 + $0x70] sm:$0xff] }
 0x100   : > { %1308 = vmatprep.subr.bf16.mxu0 %v1665_v50 }
 0x102   : > { %1309 = vmatpush2.bf16.msra.mxu0 %v1664_v42 }
 0x103   : > { %1700 = vmatprep.subr.mxu0 %v1890_v40 }
 0x104   : > { %v1812_v1 = vld [vmem:[#allocation2 + $0xc8] ss:$12 sps:$4 sm:$0xff]   ;;  %v1042_v58 = vpop.permute.xlu1 %1041 }
 0x105   : > { %1311 = vmatmul.mubr.bf16.vlgmr.msra.gmra.mxu0 %v1813_v11  ;;  %1360 = vmatpush2.bf16.msra.mxu1 %v1812_v1 }
 0x106   : > { %1701 = vmatpush3.msra.mxu0 %v1405_v38  ;;  %1677 = vmatprep.mubr.msk.bf16.mxu0 %vm2779_vm11, %v1639_v45  ;;  %v1047_v62 = vpop.permute.xlu0 %1046 }
 0x107   : > { %1702 = vmatprep.subr.mxu0 %v1890_v40 }
 0x108   : > { %1703 = vmatpush3.msra.mxu0 %v1404_v43  ;;  %1362 = vmatmul.mubr.bf16.vlgmr.msra.gmra.mxu1 %v1813_v11 }
 0x109   : > { %1704 = vmatprep.subr.mxu0 %v1890_v40  ;;  %1679 = vmatprep.mubr.msk.bf16.mxu1 %vm2780_vm15, %v1639_v45 }
 0x10a   : > { %1705 = vmatpush3.msra.mxu0 %v1403_v4 }
 0x10b   : > { %1706 = vmatprep.subr.mxu0 %v1890_v40 }
 0x10c   : > { %1707 = vmatpush3.msra.mxu0 %v1402_v6  ;;  %v1052_v26 = vpop.permute.xlu1 %1051 }
 0x10d   : > { %1708 = vmatprep.subr.mxu0 %v1890_v40  ;;  %1321 = vmatmul.mubr.bf16.gmra.mxu0 %v1638_v30 }
 0x10e   : > { %1709 = vmatpush3.msra.mxu0 %v1401_v0  ;;  %1732 = vmatprep.mubr.msk.f32.mxu0 %vm1891_vm0, %v1890_v40 }
 0x10f   : > { %1710 = vmatprep.subr.mxu0 %v1890_v40 }
 0x110   : > { %1711 = vmatpush3.msra.mxu0 %v1400_v3  ;;  %1370 = vmatmul.mubr.bf16.gmra.mxu1 %v1638_v30 }
 0x111   : > { %1712 = vmatprep.subr.mxu0 %v1890_v40 }
 0x112   : > { %1713 = vmatpush3.msra.mxu0 %v1399_v8 }
 0x113   : > { %1714 = vmatprep.subr.mxu0 %v1890_v40 }
 0x114   : > { %1715 = vmatpush3.msra.mxu0 %v1398_v36 }
 0x115   : > { %1716 = vmatprep.subr.mxu0 %v1890_v40 }
 0x116   : > { %1717 = vmatpush3.msra.mxu0 %v1397_v55 }
 0x117   : > { %1718 = vmatprep.subr.mxu0 %v1890_v40 }
 0x118   : > { %1719 = vmatpush3.msra.mxu0 %v1396_v56 }
 0x119   : > { %1720 = vmatprep.subr.mxu0 %v1890_v40 }
 0x11a   : > { %1721 = vmatpush3.msra.mxu0 %v1395_v9 }
 0x11b   : > { %1722 = vmatprep.subr.mxu0 %v1890_v40 }
 0x11c   : > { %1723 = vmatpush3.msra.mxu0 %v1394_v10 }
 0x11d   : > { %1724 = vmatprep.subr.mxu0 %v1890_v40 }
 0x11e   : > { %1725 = vmatpush3.msra.mxu0 %v1393_v47 }
 0x11f   : > { %1726 = vmatprep.subr.mxu0 %v1890_v40 }
 0x120   : > { %1727 = vmatpush3.msra.mxu0 %v1392_v39 }
 0x121   : > { %1728 = vmatprep.subr.mxu0 %v1890_v40 }
 0x122   : > { %1729 = vmatpush3.msra.mxu0 %v1391_v57 }
 0x123   : > { %1730 = vmatprep.subr.mxu0 %v1890_v40 }
 0x124   : > { %1731 = vmatpush3.msra.mxu0 %v1390_v54 }
 0x125   : > { %1733 = vmatmul.mubr.f32.vlgmr.msra.gmra.mxu0 %v2404_v29 }
 0x1c5   : > { %v1312_v61 = vpop.f32.mrf.mxu0 }
 0x1c6   : > { %v1313_v13 = vadd.f32 %v1312_v61, %v1042_v58 }
 0x1c7   : > { %v1314_v20 = vpop.f32.mrf.mxu0 }
 0x1c8   : > { %1377 = vst [vmem:[%s2651_s9] sm:$0xff] %v1313_v13  ;;  %v1315_v63 = vadd.f32 %v1314_v20, %v1042_v58  ;;  %v1363_v29 = vpop.f32.mrf.mxu1 }
 0x1c9   : > { %v1316_v5 = vpop.f32.mrf.mxu0  ;;  %v1364_v25 = vadd.f32 %v1363_v29, %v1042_v58 }
 0x1ca   : > { %1378 = vst [vmem:[%s2651_s9 + $0x8] sm:$0xff] %v1315_v63  ;;  %v1317_v60 = vadd.f32 %v1316_v5, %v1047_v62  ;;  %v1365_v31 = vpop.f32.mrf.mxu1 }
 0x1cb   : > { %v1318_v18 = vpop.f32.mrf.mxu0  ;;  %1379 = vst [vmem:[%s2651_s9 + $0x10] sm:$0xff] %v1364_v25 }
 0x1cc   : > { %1380 = vst [vmem:[%s2651_s9 + $0x18] sm:$0xff] %v1317_v60  ;;  %v1319_v33 = vadd.f32 %v1318_v18, %v1047_v62  ;;  %v1366_v15 = vpop.f32.mrf.mxu1 }
 0x1cd   : > { %v1322_v49 = vpop.f32.mrf.mxu0  ;;  %v1367_v21 = vadd.f32 %v1366_v15, %v1047_v62 }
 0x1ce   : > { %1381 = vst [vmem:[%s2651_s9 + $0x20] sm:$0xff] %v1319_v33  ;;  %v1323_v19 = vadd.f32 %v1322_v49, %v1052_v26  ;;  %v1368_v59 = vpop.f32.mrf.mxu1 }
 0x1cf   : > { %v1324_v14 = vpop.f32.mrf.mxu0  ;;  %1382 = vst [vmem:[%s2651_s9 + $0x28] sm:$0xff] %v1367_v21 }
 0x1d0   : > { %v1325_v22 = vadd.f32 %v1324_v14, %v1052_v26  ;;  %1383 = vst [vmem:[%s2651_s9 + $0x30] sm:$0xff] %v1323_v19  ;;  %v1371_v23 = vpop.f32.mrf.mxu1 }
 0x1d1   : > { %v1326_v53 = vpop.f32.mrf.mxu0  ;;  %v1372_v32 = vadd.f32 %v1371_v23, %v1052_v26 }
 0x1d2   : > { %1384 = vst [vmem:[%s2651_s9 + $0x38] sm:$0xff] %v1325_v22  ;;  %v1373_v16 = vpop.f32.mrf.mxu1 }
 0x1d3   : > { %v1327_v24 = vpop.f32.mrf.mxu0  ;;  %1385 = vst [vmem:[%s2651_s9 + $0x40] sm:$0xff] %v1372_v32 }
 0x1d4   : > { %v1374_v28 = vpop.f32.mrf.mxu1 }
 0x1d5   : > { %1831 = shalt.err (!%p1828_p3)
}
 0x1d6   : > { %s1832_s23 = scalar_lea.hbm %s2665_s13, 1152  ;;  %s1836_s9 = scalar_lea.hbm %s2722_s5, 2304 }
 0x1d7   : > { %p1833_p4 = scmp.ne.s32.totalorder %s2665_s13, %s1832_s23  ;;  %p1837_p9 = scmp.lt.s32.totalorder %s2665_s13, %s2722_s5 }
 0x1d8   : > { %p1838_p10 = scmp.lt.s32.totalorder %s1836_s9, %s1832_s23 }
 0x1d9   : > { %p1834_p7 = pnand %p1833_p4, %p1973_p5 }
 0x1da   : > { %p1839_p11 = por %p1838_p10, %p1837_p9 }
 0x1db   : > { %p1835_p8 = pneg %p1834_p7 }
 0x1dd   : > { %p1840_p12 = pnand %p1839_p11, %p1835_p8 }
 0x1df   : > { %1843 = shalt.err (!%p1840_p12)
}
 0x1e0   : > { %s1893_s18 = smov 384   ;;  %s1894_s19 = smov 24   ;;  %v1375_v17 = vpop.f32.mrf.mxu1  ;;  %vm1476_vm2 = vcmask 206848  }
 0x1e1   : > { %1738 = dma.vmem_to_hbm [thread:$0]  (%p1973_p5), %s2668_s16, 1152, %s2665_s13, %s2673_s28, %s1893_s18, %s1893_s18, %s1894_s19  }
 0x1e2   : > { %s314_s22 = scalar_lea.vmem %s2724_s7, %s2379_s15 }
 0x1e5   : > { %v1472_v34 = vpop.f32.mrf.mxu0 }
 0x1e6   : > { %1477 = vst.msk [vmem:[%s314_s22] sm:$0x7] %vm1476_vm2, %v1472_v34 }
 0x1e7   : > { %v1734_v35 = vpop.f32.mrf.mxu0 }
 0x1e8 PF: > { %p1744_p13 = scmp.ge.s32.totalorder %s1878_s27, 2  ;;  %s1521_s23 = sand.u32 1, %s1866_s24  }
 0x1e9   : > { %s1522_s11 = scalar_lea.sflag [#allocation4], %s1521_s23 }
 0x1ea   : > { %p1741_p0 = pnand %p1744_p13, %p1977_p6 }
 0x1ec   : > { %p1742_p1 = pneg %p1741_p0 }
 0x1ee   : > { %1861 = dma.done.wait (%p1742_p1), %s1522_s11, 1152  }
 0x1ef   : > { %1863 = vsyncadd (%p1742_p1), %s1522_s11, 4294966144  ;;  %p18_p5 = scmp.ge.s32.totalorder %s1960_s30, 4   ;;  %s2781_s24 = smov %s1870_s25 }
 0x1f0   : > { %s2782_s25 = smov %s1874_s26  ;;  %s2783_s26 = smov %s1971_s10 }
 0x1f1   : > { %s2784_s27 = smov %s1960_s30  ;;  %20 = sbr.rel (!%p18_p5) target bundleno = 3 (0x3), region = 102 }
 0x1f6   :  { %1541 = vsyncpa [#allocation4], 1 }
 0x1f7   :  { %1543 = vsyncpa [#allocation4 + $0x1], 1 }

</bundles_post_ra>
